<compile_context>
chip_gen: v7x
topology: tpu7x:2x2x1
jax: 0.10.0
libtpu: 0.0.40
codegen_flags: <defaults>
</compile_context>

<pallas_src>
import functools
import math

import jax
import jax.numpy as jnp
from jax.experimental import pallas as pl
from jax.experimental.pallas import tpu as pltpu

DROPOUT_P = 0.1


def _attn_kernel(q_ref, k_ref, v_ref, mask_ref, drop_ref, o_ref, *, sm_scale):
    """One batch element per grid step; all heads batched together.

    Ref shapes (leading batch dim squeezed by the BlockSpecs):
      q_ref    (H, Lq, D)
      k_ref    (H, Lk, D)
      v_ref    (H, Lk, Dv)
      mask_ref (H, Lq, Lk)
      drop_ref (H, Lq, Lk)   holds 0.0 or 1/keep_prob (inverted dropout scale)
      o_ref    (H, Lq, Dv)
    """
    # Fold 1/sqrt(d) into q (Lq*D elements) instead of scaling Lq*Lk scores.
    q = q_ref[...] * sm_scale

    # scores = q @ k^T batched over heads; contract last dims directly so no
    # transpose of k is materialized before the MXU.
    scores = jnp.einsum("hqd,hkd->hqk", q, k_ref[...],
                        preferred_element_type=jnp.float32)
    att = scores + mask_ref[...].astype(jnp.float32)

    # Numerically stable softmax along the key axis.
    att_max = jnp.max(att, axis=-1, keepdims=True)
    p = jnp.exp(att - att_max)
    denom = jnp.sum(p, axis=-1, keepdims=True)
    inv_denom = 1.0 / denom                      # tiny (H, Lq, 1) division

    # softmax * dropout; drop_ref already carries the 1/keep_prob scale, so this
    # is a single full-size multiply (plus the broadcast normalize).
    w = p * inv_denom * drop_ref[...]

    out = jnp.einsum("hqk,hkd->hqd", w.astype(v_ref.dtype), v_ref[...],
                     preferred_element_type=jnp.float32)
    o_ref[...] = out.astype(o_ref.dtype)


def attention(q, k, v, mask, *, dropout_p=DROPOUT_P, training=True, rng_key=None):
    B, H, Lq, D = q.shape
    _, _, Lk, _ = k.shape
    Dv = v.shape[-1]

    # Dropout mask generated host-side (in-kernel pltpu.prng_* has no
    # CPU/interpret lowering). Values are the inverted-dropout scale:
    # 0.0 (dropped) or 1/keep_prob (kept). p==0 / eval mode -> all ones.
    if training and dropout_p > 0.0:
        if rng_key is None:
            rng_key = jax.random.PRNGKey(0)
        keep_prob = 1.0 - dropout_p
        keep = jax.random.bernoulli(rng_key, keep_prob, (B, H, Lq, Lk))
        drop_scale = keep.astype(q.dtype) * jnp.asarray(1.0 / keep_prob, q.dtype)
    else:
        drop_scale = jnp.ones((B, H, Lq, Lk), q.dtype)

    out_bytes = B * H * Lq * Dv * jnp.dtype(q.dtype).itemsize
    cost = pl.CostEstimate(
        flops=2 * B * H * Lq * Lk * (D + Dv),
        transcendentals=B * H * Lq * Lk,
        bytes_accessed=int(q.nbytes + k.nbytes + v.nbytes + mask.nbytes
                           + drop_scale.nbytes + out_bytes),
    )

    kernel = functools.partial(_attn_kernel, sm_scale=1.0 / math.sqrt(D))

    # TODO(synk): for long sequences (Lq*Lk blocks exceeding VMEM, esp. v7x's
    # 64 MiB) this should switch to an Lk-tiled online-softmax (flash) variant.
    return pl.pallas_call(
        kernel,
        out_shape=jax.ShapeDtypeStruct((B, H, Lq, Dv), q.dtype),
        grid=(B,),
        in_specs=[
            pl.BlockSpec((None, H, Lq, D), lambda b: (b, 0, 0, 0)),
            pl.BlockSpec((None, H, Lk, D), lambda b: (b, 0, 0, 0)),
            pl.BlockSpec((None, H, Lk, Dv), lambda b: (b, 0, 0, 0)),
            pl.BlockSpec((None, H, Lq, Lk), lambda b: (b, 0, 0, 0)),
            pl.BlockSpec((None, H, Lq, Lk), lambda b: (b, 0, 0, 0)),
        ],
        out_specs=pl.BlockSpec((None, H, Lq, Dv), lambda b: (b, 0, 0, 0)),
        compiler_params=pltpu.CompilerParams(
            dimension_semantics=("parallel",),
        ),
        cost_estimate=cost,
    )(q, k, v, mask, drop_scale)


def _reference(q, k, v, mask, drop_scale):
    d = q.shape[-1]
    scores = jnp.einsum("bhqd,bhkd->bhqk", q, k,
                        precision=jax.lax.Precision.HIGHEST) / math.sqrt(d)
    w = jax.nn.softmax(scores + mask, axis=-1) * drop_scale
    return jnp.einsum("bhqk,bhkd->bhqd", w, v,
                      precision=jax.lax.Precision.HIGHEST)


if __name__ == "__main__":
    B, H, Lq, Lk, D, Dv = 2, 4, 128, 128, 32, 32

    key = jax.random.PRNGKey(0)
    kq, kk, kv, km = jax.random.split(key, 4)
    q = jax.random.normal(kq, (B, H, Lq, D), dtype=jnp.float32)
    k = jax.random.normal(kk, (B, H, Lk, D), dtype=jnp.float32)
    v = jax.random.normal(kv, (B, H, Lk, Dv), dtype=jnp.float32)
    mask = jax.random.normal(km, (B, H, Lq, Lk), dtype=jnp.float32)

    # Forward pass matching the PyTorch module (dropout active, p=0.1).
    out = jax.block_until_ready(
        attention(q, k, v, mask, dropout_p=DROPOUT_P, training=True))
    assert out.shape == (B, H, Lq, Dv)
    assert bool(jnp.all(jnp.isfinite(out)))

    # Sanity check the deterministic (dropout-disabled) path against pure JAX.
    out_nodrop = jax.block_until_ready(
        attention(q, k, v, mask, dropout_p=0.0, training=False))
    ref = _reference(q, k, v, mask, jnp.ones((B, H, Lq, Lk), jnp.float32))
    assert jnp.allclose(out_nodrop, ref, atol=1e-2, rtol=1e-2), (
        float(jnp.max(jnp.abs(out_nodrop - ref))))

    print("KERNEL_OK")
</pallas_src>

<mosaic_0001>
module attributes {stable_mosaic.version = 11 : i64} {
  func.func @_attn_kernel(%arg0: i32, %arg1: memref<1x4x128x32xf32, #tpu.memory_space<vmem>>, %arg2: memref<1x4x128x32xf32, #tpu.memory_space<vmem>>, %arg3: memref<1x4x128x32xf32, #tpu.memory_space<vmem>>, %arg4: memref<1x4x128x128xf32, #tpu.memory_space<vmem>>, %arg5: memref<1x4x128x128xf32, #tpu.memory_space<vmem>>, %arg6: memref<1x4x128x32xf32, #tpu.memory_space<vmem>>) attributes {dimension_semantics = [#tpu.dimension_semantics<parallel>], iteration_bounds = array<i64: 2>, scalar_prefetch = 0 : i64, scratch_operands = 0 : i64, tpu.core_type = #tpu.core_type<tc>, window_params = [{transform_indices = @transform_0, window_bounds = array<i64: 1, 4, 128, 32>}, {transform_indices = @transform_1, window_bounds = array<i64: 1, 4, 128, 32>}, {transform_indices = @transform_2, window_bounds = array<i64: 1, 4, 128, 32>}, {transform_indices = @transform_3, window_bounds = array<i64: 1, 4, 128, 128>}, {transform_indices = @transform_4, window_bounds = array<i64: 1, 4, 128, 128>}, {transform_indices = @transform_5, window_bounds = array<i64: 1, 4, 128, 32>}]} {
    %c0 = arith.constant 0 : index
    %c0_0 = arith.constant 0 : index
    %c0_1 = arith.constant 0 : index
    %c0_2 = arith.constant 0 : index
    %0 = vector.load %arg1[%c0, %c0_0, %c0_1, %c0_2] : memref<1x4x128x32xf32, #tpu.memory_space<vmem>>, vector<1x4x128x32xf32>
    %1 = vector.shape_cast %0 : vector<1x4x128x32xf32> to vector<4x128x32xf32>
    %cst = arith.constant 0.176776692 : f32
    %2 = vector.broadcast %cst : f32 to vector<4x128x32xf32>
    %3 = arith.mulf %1, %2 : vector<4x128x32xf32>
    %c0_3 = arith.constant 0 : index
    %c0_4 = arith.constant 0 : index
    %c0_5 = arith.constant 0 : index
    %c0_6 = arith.constant 0 : index
    %4 = vector.load %arg2[%c0_3, %c0_4, %c0_5, %c0_6] : memref<1x4x128x32xf32, #tpu.memory_space<vmem>>, vector<1x4x128x32xf32>
    %5 = vector.shape_cast %4 : vector<1x4x128x32xf32> to vector<4x128x32xf32>
    "tpu.trace_start"() <{level = 10 : i32, message = "hqd,hkd->hqk"}> : () -> ()
    %cst_7 = arith.constant dense<0.000000e+00> : vector<4x128x128xf32>
    %6 = tpu.matmul %3, %5, %cst_7 {dimension_numbers = #tpu.dot_dimension_numbers<[2], [2], [1], [1], [0, 0, 0, 1, 1, 1], [0], [0]>} : vector<4x128x32xf32>, vector<4x128x32xf32>, vector<4x128x128xf32> -> vector<4x128x128xf32>
    "tpu.trace_stop"() : () -> ()
    %c0_8 = arith.constant 0 : index
    %c0_9 = arith.constant 0 : index
    %c0_10 = arith.constant 0 : index
    %c0_11 = arith.constant 0 : index
    %7 = vector.load %arg4[%c0_8, %c0_9, %c0_10, %c0_11] : memref<1x4x128x128xf32, #tpu.memory_space<vmem>>, vector<1x4x128x128xf32>
    %8 = vector.shape_cast %7 : vector<1x4x128x128xf32> to vector<4x128x128xf32>
    %9 = arith.addf %6, %8 : vector<4x128x128xf32>
    %cst_12 = arith.constant dense<0xFF800000> : vector<4x128xf32>
    %10 = vector.multi_reduction <maximumf>, %9, %cst_12 [2] : vector<4x128x128xf32> to vector<4x128xf32>
    %11 = vector.shape_cast %10 : vector<4x128xf32> to vector<4x128x1xf32>
    %12 = vector.broadcast %11 : vector<4x128x1xf32> to vector<4x128x128xf32>
    %13 = arith.subf %9, %12 : vector<4x128x128xf32>
    %14 = math.exp %13 : vector<4x128x128xf32>
    %cst_13 = arith.constant dense<0.000000e+00> : vector<4x128xf32>
    %15 = vector.multi_reduction <add>, %14, %cst_13 [2] : vector<4x128x128xf32> to vector<4x128xf32>
    %16 = vector.shape_cast %15 : vector<4x128xf32> to vector<4x128x1xf32>
    %cst_14 = arith.constant 1.000000e+00 : f32
    %17 = vector.broadcast %cst_14 : f32 to vector<4x128x1xf32>
    %18 = arith.divf %17, %16 : vector<4x128x1xf32>
    %19 = vector.broadcast %18 : vector<4x128x1xf32> to vector<4x128x128xf32>
    %20 = arith.mulf %14, %19 : vector<4x128x128xf32>
    %c0_15 = arith.constant 0 : index
    %c0_16 = arith.constant 0 : index
    %c0_17 = arith.constant 0 : index
    %c0_18 = arith.constant 0 : index
    %21 = vector.load %arg5[%c0_15, %c0_16, %c0_17, %c0_18] : memref<1x4x128x128xf32, #tpu.memory_space<vmem>>, vector<1x4x128x128xf32>
    %22 = vector.shape_cast %21 : vector<1x4x128x128xf32> to vector<4x128x128xf32>
    %23 = arith.mulf %20, %22 : vector<4x128x128xf32>
    %c0_19 = arith.constant 0 : index
    %c0_20 = arith.constant 0 : index
    %c0_21 = arith.constant 0 : index
    %c0_22 = arith.constant 0 : index
    %24 = vector.load %arg3[%c0_19, %c0_20, %c0_21, %c0_22] : memref<1x4x128x32xf32, #tpu.memory_space<vmem>>, vector<1x4x128x32xf32>
    %25 = vector.shape_cast %24 : vector<1x4x128x32xf32> to vector<4x128x32xf32>
    "tpu.trace_start"() <{level = 10 : i32, message = "hqk,hkd->hqd"}> : () -> ()
    %cst_23 = arith.constant dense<0.000000e+00> : vector<4x128x32xf32>
    %26 = tpu.matmul %23, %25, %cst_23 {dimension_numbers = #tpu.dot_dimension_numbers<[2], [1], [1], [2], [0, 0, 0, 1, 1, 2], [0], [0]>} : vector<4x128x128xf32>, vector<4x128x32xf32>, vector<4x128x32xf32> -> vector<4x128x32xf32>
    "tpu.trace_stop"() : () -> ()
    %c0_24 = arith.constant 0 : index
    %c0_25 = arith.constant 0 : index
    %c0_26 = arith.constant 0 : index
    %c0_27 = arith.constant 0 : index
    %27 = vector.load %arg6[%c0_24, %c0_25, %c0_26, %c0_27] : memref<1x4x128x32xf32, #tpu.memory_space<vmem>>, vector<1x4x128x32xf32>
    %28 = vector.shape_cast %27 : vector<1x4x128x32xf32> to vector<4x128x32xf32>
    %29 = vector.shape_cast %26 : vector<4x128x32xf32> to vector<1x4x128x32xf32>
    tpu.vector_store %arg6[%c0_24, %c0_25, %c0_26, %c0_27], %29 {strides = array<i32>} : memref<1x4x128x32xf32, #tpu.memory_space<vmem>>, vector<1x4x128x32xf32>,
    return
  }
  func.func @transform_0(%arg0: i32) -> (i32, i32, i32, i32) {
    %c0_i32 = arith.constant 0 : i32
    %c0_i32_0 = arith.constant 0 : i32
    %c0_i32_1 = arith.constant 0 : i32
    %c0_i32_2 = arith.constant 0 : i32
    return %arg0, %c0_i32, %c0_i32_0, %c0_i32_1 : i32, i32, i32, i32
  }
  func.func @transform_1(%arg0: i32) -> (i32, i32, i32, i32) {
    %c0_i32 = arith.constant 0 : i32
    %c0_i32_0 = arith.constant 0 : i32
    %c0_i32_1 = arith.constant 0 : i32
    %c0_i32_2 = arith.constant 0 : i32
    return %arg0, %c0_i32, %c0_i32_0, %c0_i32_1 : i32, i32, i32, i32
  }
  func.func @transform_2(%arg0: i32) -> (i32, i32, i32, i32) {
    %c0_i32 = arith.constant 0 : i32
    %c0_i32_0 = arith.constant 0 : i32
    %c0_i32_1 = arith.constant 0 : i32
    %c0_i32_2 = arith.constant 0 : i32
    return %arg0, %c0_i32, %c0_i32_0, %c0_i32_1 : i32, i32, i32, i32
  }
  func.func @transform_3(%arg0: i32) -> (i32, i32, i32, i32) {
    %c0_i32 = arith.constant 0 : i32
    %c0_i32_0 = arith.constant 0 : i32
    %c0_i32_1 = arith.constant 0 : i32
    %c0_i32_2 = arith.constant 0 : i32
    return %arg0, %c0_i32, %c0_i32_0, %c0_i32_1 : i32, i32, i32, i32
  }
  func.func @transform_4(%arg0: i32) -> (i32, i32, i32, i32) {
    %c0_i32 = arith.constant 0 : i32
    %c0_i32_0 = arith.constant 0 : i32
    %c0_i32_1 = arith.constant 0 : i32
    %c0_i32_2 = arith.constant 0 : i32
    return %arg0, %c0_i32, %c0_i32_0, %c0_i32_1 : i32, i32, i32, i32
  }
  func.func @transform_5(%arg0: i32) -> (i32, i32, i32, i32) {
    %c0_i32 = arith.constant 0 : i32
    %c0_i32_0 = arith.constant 0 : i32
    %c0_i32_1 = arith.constant 0 : i32
    %c0_i32_2 = arith.constant 0 : i32
    return %arg0, %c0_i32, %c0_i32_0, %c0_i32_1 : i32, i32, i32, i32
  }
}

</mosaic_0001>

<bundles_post_ra>
// kernel: tpu_custom_call.1
= control target key start
LH: loop header
LB: loop body
LE: loop exit
PB: predicated region body
PF: predicated region fallthrough
CT: control target
= control target key end

     0   :  { %s4584_s18 = smov 0   ;;  %s5799_s0 = inlined_call_operand.vmem [shape: f32[2,4,128,32], index: 0, kind: input, shape index: {}]   ;;  %s5800_s1 = inlined_call_operand.vmem [shape: f32[2,4,128,32], index: 1, kind: input, shape index: {}]   ;;  %s5801_s2 = inlined_call_operand.vmem [shape: f32[2,4,128,32], index: 2, kind: input, shape index: {}]   ;;  %s5802_s3 = inlined_call_operand.vmem [shape: f32[2,4,128,128], index: 3, kind: input, shape index: {}]   ;;  %s5803_s4 = inlined_call_operand.vmem [shape: f32[2,4,128,128], index: 4, kind: input, shape index: {}]   ;;  %s5804_s5 = inlined_call_operand.vmem [shape: f32[2,4,128,32], index: 5, kind: output, shape index: {}]  }
   0x1 LB: > { %s3105_s19 = sadd.s32 4294967295, %s4552_s18   ;;  %p3109_p0 = scmp.ge.s32.totalorder %s4552_s18, 1  ;;  %s4552_s18 = sphi %s4584_s18, %s15_s18  }
   0x2   : > { %p227_p1 = scmp.lt.s32.totalorder %s4552_s18, 3 }
   0x4   : > { %p228_p2 = pnand %p3109_p0, %p227_p1 }
   0x6   : > { %231 = sbr.rel (%p228_p2) target bundleno = 957 (0x3bd), region = 40 }
   0xd   : > { %p275_p3 = scmp.lt.s32.totalorder %s3105_s19, 1  ;;  %vm561_vm0 = vcmask 261120  }
   0xe   : > { %vm4602_vm1 = vmpackc.low %vm561_vm0, %vm561_vm0 }
   0xf   : > { %s5916_s19 = smov (!%p275_p3, %s3105_s19), 1 }
  0x10   : > { %s4592_s20 = sshll.u32 %s5916_s19, 9 }
  0x11   : > { %s4598_s23 = scalar_lea.vmem %s5800_s1, %s4592_s20  ;;  %s4634_s26 = scalar_lea.vmem %s5799_s0, %s4592_s20 }
  0x12   : > { %v433_v1 = vld [vmem:[%s4598_s23] sm:$0xff]  ;;  %v434_v2 = vld [vmem:[%s4598_s23 + $0x8] sm:$0xff]  ;;  %v435_v6 = vld [vmem:[%s4598_s23 + $0x10] sm:$0xff]  ;;  %s4936_s29 = scalar_lea.vmem %s5802_s3, %s4592_s20  ;;  %s5208_s7 = scalar_lea.vmem %s5801_s2, %s4592_s20 }
  0x13   : > { %v449_v3 = vld [vmem:[%s4598_s23 + $0x80] sm:$0xff]  ;;  %v3962_v4 = vpack.c.bf16 %v434_v2, %v433_v1  ;;  %v450_v5 = vld [vmem:[%s4598_s23 + $0x88] sm:$0xff]  ;;  %v436_v7 = vld [vmem:[%s4598_s23 + $0x18] sm:$0xff]  ;;  %s5502_s10 = scalar_lea.vmem %s5803_s4, %s4592_s20  ;;  %s5666_s13 = scalar_lea.vmem %s5804_s5, %s4592_s20 }
  0x14   : > { %v4010_v8 = vpack.c.bf16 %v450_v5, %v449_v3  ;;  %v3968_v9 = vpack.c.bf16 %v436_v7, %v435_v6  ;;  %v451_v10 = vld [vmem:[%s4598_s23 + $0x90] sm:$0xff]  ;;  %v452_v11 = vld [vmem:[%s4598_s23 + $0x98] sm:$0xff]  ;;  %v437_v13 = vld [vmem:[%s4598_s23 + $0x20] sm:$0xff] }
  0x15   : > { %3964 = vmatprep.subr.msk.bf16.mxu0 %vm4602_vm1, %v3962_v4  ;;  %v4016_v12 = vpack.c.bf16 %v452_v11, %v451_v10  ;;  %v438_v14 = vld [vmem:[%s4598_s23 + $0x28] sm:$0xff]  ;;  %v453_v15 = vld [vmem:[%s4598_s23 + $0xa0] sm:$0xff]  ;;  %v439_v23 = vld [vmem:[%s4598_s23 + $0x30] sm:$0xff] }
  0x16   : > { %4012 = vmatprep.subr.msk.bf16.mxu1 %vm4602_vm1, %v4010_v8  ;;  %3967 = vmatpush3.bf16.xpose.msk.msra.mxu0 %vm4602_vm1, %v3962_v4  ;;  %v454_v16 = vld [vmem:[%s4598_s23 + $0xa8] sm:$0xff]  ;;  %v3974_v17 = vpack.c.bf16 %v438_v14, %v437_v13  ;;  %v305_v19 = vld [vmem:[%s4634_s26] sm:$0xff]  ;;  %v440_v24 = vld [vmem:[%s4598_s23 + $0x38] sm:$0xff] }
  0x17   : > { %4015 = vmatpush3.bf16.xpose.msk.msra.mxu1 %vm4602_vm1, %v4010_v8  ;;  %3970 = vmatprep.subr.msk.bf16.mxu0 %vm4602_vm1, %v3968_v9  ;;  %v4022_v18 = vpack.c.bf16 %v454_v16, %v453_v15  ;;  %v369_v20 = vmul.f32 0.17677669, %v305_v19  ;;  %v321_v21 = vld [vmem:[%s4634_s26 + $0x80] sm:$0xff]  ;;  %v455_v25 = vld [vmem:[%s4598_s23 + $0xb0] sm:$0xff]  ;;  %v456_v26 = vld [vmem:[%s4598_s23 + $0xb8] sm:$0xff]  ;;  %v3980_v27 = vpack.c.bf16 %v440_v24, %v439_v23 }
  0x18   : > { %4018 = vmatprep.subr.msk.bf16.mxu1 %vm4602_vm1, %v4016_v12  ;;  %v385_v22 = vmul.f32 0.17677669, %v321_v21  ;;  %v4028_v28 = vpack.c.bf16 %v456_v26, %v455_v25  ;;  %v441_v29 = vld [vmem:[%s4598_s23 + $0x40] sm:$0xff]  ;;  %v442_v30 = vld [vmem:[%s4598_s23 + $0x48] sm:$0xff]  ;;  %v443_v35 = vld [vmem:[%s4598_s23 + $0x50] sm:$0xff] }
  0x19   : > { %3546 = vmatprep.mubr.msk.f32.mxu0 %vm561_vm0, %v369_v20  ;;  %v457_v31 = vld [vmem:[%s4598_s23 + $0xc0] sm:$0xff]  ;;  %v458_v32 = vld [vmem:[%s4598_s23 + $0xc8] sm:$0xff]  ;;  %v3986_v33 = vpack.c.bf16 %v442_v30, %v441_v29  ;;  %v444_v36 = vld [vmem:[%s4598_s23 + $0x58] sm:$0xff] }
  0x1a   : > { %3602 = vmatprep.mubr.msk.f32.mxu1 %vm561_vm0, %v385_v22  ;;  %v4034_v34 = vpack.c.bf16 %v458_v32, %v457_v31  ;;  %v459_v37 = vld [vmem:[%s4598_s23 + $0xd0] sm:$0xff]  ;;  %v460_v38 = vld [vmem:[%s4598_s23 + $0xd8] sm:$0xff]  ;;  %v3992_v39 = vpack.c.bf16 %v444_v36, %v443_v35  ;;  %v445_v41 = vld [vmem:[%s4598_s23 + $0x60] sm:$0xff] }
  0x1b   : > { %v4040_v40 = vpack.c.bf16 %v460_v38, %v459_v37  ;;  %v446_v42 = vld [vmem:[%s4598_s23 + $0x68] sm:$0xff]  ;;  %v461_v43 = vld [vmem:[%s4598_s23 + $0xe0] sm:$0xff]  ;;  %v447_v47 = vld [vmem:[%s4598_s23 + $0x70] sm:$0xff] }
  0x1c   : > { %v462_v44 = vld [vmem:[%s4598_s23 + $0xe8] sm:$0xff]  ;;  %v3998_v45 = vpack.c.bf16 %v446_v42, %v445_v41  ;;  %v448_v48 = vld [vmem:[%s4598_s23 + $0x78] sm:$0xff]  ;;  %v463_v49 = vld [vmem:[%s4598_s23 + $0xf0] sm:$0xff] }
  0x1d   : > { %v4046_v46 = vpack.c.bf16 %v462_v44, %v461_v43  ;;  %v464_v50 = vld [vmem:[%s4598_s23 + $0xf8] sm:$0xff]  ;;  %v4004_v51 = vpack.c.bf16 %v448_v48, %v447_v47  ;;  %v465_v53 = vld [vmem:[%s4598_s23 + $0x100] sm:$0xff]  ;;  %v466_v54 = vld [vmem:[%s4598_s23 + $0x108] sm:$0xff] }
  0x1e   : > { %3973 = vmatpush3.bf16.xpose.msk.msra.mxu0 %vm4602_vm1, %v3968_v9  ;;  %v4052_v52 = vpack.c.bf16 %v464_v50, %v463_v49  ;;  %v481_v55 = vld [vmem:[%s4598_s23 + $0x180] sm:$0xff]  ;;  %v482_v56 = vld [vmem:[%s4598_s23 + $0x188] sm:$0xff]  ;;  %v4058_v57 = vpack.c.bf16 %v466_v54, %v465_v53  ;;  %v307_v61 = vld [vmem:[%s4634_s26 + $0x10] sm:$0xff] }
  0x1f   : > { %4021 = vmatpush3.bf16.xpose.msk.msra.mxu1 %vm4602_vm1, %v4016_v12  ;;  %3976 = vmatprep.subr.msk.bf16.mxu0 %vm4602_vm1, %v3974_v17  ;;  %v4106_v58 = vpack.c.bf16 %v482_v56, %v481_v55  ;;  %v306_v59 = vld [vmem:[%s4634_s26 + $0x8] sm:$0xff]  ;;  %v323_v63 = vld [vmem:[%s4634_s26 + $0x90] sm:$0xff]  ;;  %v468_v2 = vld [vmem:[%s4598_s23 + $0x118] sm:$0xff]  ;;  %v371_v7 = vmul.f32 0.17677669, %v307_v61 }
  0x20   : > { %4024 = vmatprep.subr.msk.bf16.mxu1 %vm4602_vm1, %v4022_v18  ;;  %v322_v60 = vld [vmem:[%s4634_s26 + $0x88] sm:$0xff]  ;;  %v370_v62 = vmul.f32 0.17677669, %v306_v59  ;;  %v467_v1 = vld [vmem:[%s4598_s23 + $0x110] sm:$0xff]  ;;  %v308_v4 = vld [vmem:[%s4634_s26 + $0x18] sm:$0xff] }
  0x21   : > { %v386_v3 = vmul.f32 0.17677669, %v322_v60  ;;  %v483_v5 = vld [vmem:[%s4598_s23 + $0x190] sm:$0xff]  ;;  %v484_v6 = vld [vmem:[%s4598_s23 + $0x198] sm:$0xff]  ;;  %v309_v9 = vld [vmem:[%s4634_s26 + $0x20] sm:$0xff]  ;;  %v4064_v11 = vpack.c.bf16 %v468_v2, %v467_v1 }
  0x22   : > { %v324_v8 = vld [vmem:[%s4634_s26 + $0x98] sm:$0xff]  ;;  %v387_v10 = vmul.f32 0.17677669, %v323_v63  ;;  %v325_v12 = vld [vmem:[%s4634_s26 + $0xa0] sm:$0xff]  ;;  %v372_v13 = vmul.f32 0.17677669, %v308_v4  ;;  %v4112_v14 = vpack.c.bf16 %v484_v6, %v483_v5 }
  0x23   : > { %v388_v15 = vmul.f32 0.17677669, %v324_v8  ;;  %v373_v16 = vmul.f32 0.17677669, %v309_v9  ;;  %v326_v19 = vld [vmem:[%s4634_s26 + $0xa8] sm:$0xff]  ;;  %v469_v20 = vld [vmem:[%s4598_s23 + $0x120] sm:$0xff] }
  0x24   : > { %v470_v21 = vld [vmem:[%s4598_s23 + $0x128] sm:$0xff]  ;;  %v485_v23 = vld [vmem:[%s4598_s23 + $0x1a0] sm:$0xff]  ;;  %v311_v25 = vld [vmem:[%s4634_s26 + $0x30] sm:$0xff]  ;;  %v390_v26 = vmul.f32 0.17677669, %v326_v19 }
  0x25   : > { %v486_v24 = vld [vmem:[%s4598_s23 + $0x1a8] sm:$0xff]  ;;  %v4070_v29 = vpack.c.bf16 %v470_v21, %v469_v20  ;;  %v328_v30 = vld [vmem:[%s4634_s26 + $0xb8] sm:$0xff]  ;;  %v313_v31 = vld [vmem:[%s4634_s26 + $0x40] sm:$0xff] }
  0x26   : > { %3979 = vmatpush3.bf16.xpose.msk.msra.mxu0 %vm4602_vm1, %v3974_v17  ;;  %v310_v17 = vld [vmem:[%s4634_s26 + $0x28] sm:$0xff]  ;;  %v4118_v32 = vpack.c.bf16 %v486_v24, %v485_v23  ;;  %v392_v37 = vmul.f32 0.17677669, %v328_v30  ;;  %v377_v38 = vmul.f32 0.17677669, %v313_v31  ;;  %v471_v42 = vld [vmem:[%s4598_s23 + $0x130] sm:$0xff] }
  0x27   : > { %4027 = vmatpush3.bf16.xpose.msk.msra.mxu1 %vm4602_vm1, %v4022_v18  ;;  %3982 = vmatprep.subr.msk.bf16.mxu0 %vm4602_vm1, %v3980_v27  ;;  %v389_v18 = vmul.f32 0.17677669, %v325_v12  ;;  %v374_v22 = vmul.f32 0.17677669, %v310_v17  ;;  %v330_v41 = vld [vmem:[%s4634_s26 + $0xc8] sm:$0xff]  ;;  %v472_v43 = vld [vmem:[%s4598_s23 + $0x138] sm:$0xff] }
  0x28   : > { %4030 = vmatprep.subr.msk.bf16.mxu1 %vm4602_vm1, %v4028_v28  ;;  %v487_v44 = vld [vmem:[%s4598_s23 + $0x1b0] sm:$0xff]  ;;  %v394_v48 = vmul.f32 0.17677669, %v330_v41  ;;  %v316_v50 = vld [vmem:[%s4634_s26 + $0x58] sm:$0xff]  ;;  %v317_v53 = vld [vmem:[%s4634_s26 + $0x60] sm:$0xff] }
  0x29   : > { %v315_v47 = vld [vmem:[%s4634_s26 + $0x50] sm:$0xff]  ;;  %v333_v56 = vld [vmem:[%s4634_s26 + $0xe0] sm:$0xff]  ;;  %v381_v60 = vmul.f32 0.17677669, %v317_v53  ;;  %v318_v61 = vld [vmem:[%s4634_s26 + $0x68] sm:$0xff] }
  0x2a   : > { %v331_v49 = vld [vmem:[%s4634_s26 + $0xd0] sm:$0xff]  ;;  %v379_v55 = vmul.f32 0.17677669, %v315_v47  ;;  %v334_v63 = vld [vmem:[%s4634_s26 + $0xe8] sm:$0xff]  ;;  %v473_v1 = vld [vmem:[%s4598_s23 + $0x140] sm:$0xff] }
  0x2b   : > { %v474_v2 = vld [vmem:[%s4598_s23 + $0x148] sm:$0xff]  ;;  %v382_v5 = vmul.f32 0.17677669, %v318_v61  ;;  %v319_v6 = vld [vmem:[%s4634_s26 + $0x70] sm:$0xff]  ;;  %v320_v9 = vld [vmem:[%s4634_s26 + $0x78] sm:$0xff] }
  0x2c   : > { %v490_v4 = vld [vmem:[%s4598_s23 + $0x1c8] sm:$0xff]  ;;  %v335_v8 = vld [vmem:[%s4634_s26 + $0xf0] sm:$0xff]  ;;  %v337_v12 = vld [vmem:[%s4634_s26 + $0x100] sm:$0xff]  ;;  %v384_v17 = vmul.f32 0.17677669, %v320_v9 }
  0x2d   : > { %v401_v19 = vmul.f32 0.17677669, %v337_v12  ;;  %v475_v21 = vld [vmem:[%s4598_s23 + $0x150] sm:$0xff]  ;;  %v492_v24 = vld [vmem:[%s4598_s23 + $0x1d8] sm:$0xff]  ;;  %v494_v30 = vld [vmem:[%s4598_s23 + $0x1e8] sm:$0xff] }
  0x2e   : > { %3985 = vmatpush3.bf16.xpose.msk.msra.mxu0 %vm4602_vm1, %v3980_v27  ;;  %v327_v27 = vld [vmem:[%s4634_s26 + $0xb0] sm:$0xff]  ;;  %v342_v53 = vld [vmem:[%s4634_s26 + $0x128] sm:$0xff]  ;;  %v344_v61 = vld [vmem:[%s4634_s26 + $0x138] sm:$0xff] }
  0x2f   : > { %4033 = vmatpush3.bf16.xpose.msk.msra.mxu1 %vm4602_vm1, %v4028_v28  ;;  %3988 = vmatprep.subr.msk.bf16.mxu0 %vm4602_vm1, %v3986_v33  ;;  %v312_v28 = vld [vmem:[%s4634_s26 + $0x38] sm:$0xff]  ;;  %v391_v35 = vmul.f32 0.17677669, %v327_v27  ;;  %v491_v23 = vld [vmem:[%s4598_s23 + $0x1d0] sm:$0xff]  ;;  %v477_v27 = vld [vmem:[%s4598_s23 + $0x160] sm:$0xff] }
  0x30   : > { %4036 = vmatprep.subr.msk.bf16.mxu1 %vm4602_vm1, %v4034_v34  ;;  %v376_v36 = vmul.f32 0.17677669, %v312_v28  ;;  %v478_v28 = vld [vmem:[%s4598_s23 + $0x168] sm:$0xff]  ;;  %v339_v41 = vld [vmem:[%s4634_s26 + $0x110] sm:$0xff] }
  0x31   : > { %v4094_v31 = vpack.c.bf16 %v478_v28, %v477_v27  ;;  %v347_v9 = vld [vmem:[%s4634_s26 + $0x150] sm:$0xff] }
  0x36   : > { %3991 = vmatpush3.bf16.xpose.msk.msra.mxu0 %vm4602_vm1, %v3986_v33  ;;  %v375_v33 = vmul.f32 0.17677669, %v311_v25 }
  0x37   : > { %4039 = vmatpush3.bf16.xpose.msk.msra.mxu1 %vm4602_vm1, %v4034_v34  ;;  %3994 = vmatprep.subr.msk.bf16.mxu0 %vm4602_vm1, %v3992_v39  ;;  %v329_v34 = vld [vmem:[%s4634_s26 + $0xc0] sm:$0xff] }
  0x38   : > { %4042 = vmatprep.subr.msk.bf16.mxu1 %vm4602_vm1, %v4040_v40 }
  0x3e   : > { %3997 = vmatpush3.bf16.xpose.msk.msra.mxu0 %vm4602_vm1, %v3992_v39  ;;  %v314_v39 = vld [vmem:[%s4634_s26 + $0x48] sm:$0xff] }
  0x3f   : > { %4045 = vmatpush3.bf16.xpose.msk.msra.mxu1 %vm4602_vm1, %v4040_v40  ;;  %4000 = vmatprep.subr.msk.bf16.mxu0 %vm4602_vm1, %v3998_v45  ;;  %v393_v40 = vmul.f32 0.17677669, %v329_v34  ;;  %v480_v34 = vld [vmem:[%s4598_s23 + $0x178] sm:$0xff] }
  0x40   : > { %4048 = vmatprep.subr.msk.bf16.mxu1 %vm4602_vm1, %v4046_v46 }
  0x46   : > { %4003 = vmatpush3.bf16.xpose.msk.msra.mxu0 %vm4602_vm1, %v3998_v45  ;;  %v488_v45 = vld [vmem:[%s4598_s23 + $0x1b8] sm:$0xff] }
  0x47   : > { %4051 = vmatpush3.bf16.xpose.msk.msra.mxu1 %vm4602_vm1, %v4046_v46  ;;  %4006 = vmatprep.subr.msk.bf16.mxu0 %vm4602_vm1, %v4004_v51  ;;  %v378_v46 = vmul.f32 0.17677669, %v314_v39  ;;  %v4124_v54 = vpack.c.bf16 %v488_v45, %v487_v44  ;;  %v338_v39 = vld [vmem:[%s4634_s26 + $0x108] sm:$0xff]  ;;  %v403_v45 = vmul.f32 0.17677669, %v339_v41 }
  0x48   : > { %4054 = vmatprep.subr.msk.bf16.mxu1 %vm4602_vm1, %v4052_v52 }
  0x4e   : > { %4009 = vmatpush3.bf16.xpose.msk.msra.mxu0 %vm4602_vm1, %v4004_v51  ;;  %v4076_v51 = vpack.c.bf16 %v472_v43, %v471_v42  ;;  %v355_v42 = vld [vmem:[%s4634_s26 + $0x190] sm:$0xff]  ;;  %v402_v43 = vmul.f32 0.17677669, %v338_v39 }
  0x4f   : > { %4057 = vmatpush3.bf16.xpose.msk.msra.mxu1 %vm4602_vm1, %v4052_v52  ;;  %4060 = vmatprep.subr.msk.bf16.mxu0 %vm4602_vm1, %v4058_v57  ;;  %v332_v52 = vld [vmem:[%s4634_s26 + $0xd8] sm:$0xff]  ;;  %v419_v47 = vmul.f32 0.17677669, %v355_v42  ;;  %v514_v42 = vld [vmem:[%s4936_s29 + $0x88] sm:$0xff] }
  0x50   : > { %4108 = vmatprep.subr.msk.bf16.mxu1 %vm4602_vm1, %v4106_v58  ;;  %v396_v59 = vmul.f32 0.17677669, %v332_v52 }
  0x55   : > { %3547 = vmatmul.mubr.msk.f32.vlgmr.msra.gmra.mrb[0].mxu0 %vm561_vm0, %v370_v62  ;;  %v397_v62 = vmul.f32 0.17677669, %v333_v56  ;;  %v343_v56 = vld [vmem:[%s4634_s26 + $0x130] sm:$0xff] }
  0x56   : > { %3603 = vmatmul.mubr.msk.f32.vlgmr.msra.gmra.mrb[0].mxu1 %vm561_vm0, %v386_v3  ;;  %4063 = vmatpush3.bf16.xpose.msk.msra.mxu0 %vm4602_vm1, %v4058_v57  ;;  %v395_v57 = vmul.f32 0.17677669, %v331_v49  ;;  %v489_v3 = vld [vmem:[%s4598_s23 + $0x1c0] sm:$0xff] }
  0x57   : > { %4111 = vmatpush3.bf16.xpose.msk.msra.mxu1 %vm4602_vm1, %v4106_v58  ;;  %3549 = vmatprep.mubr.msk.f32.mxu0 %vm561_vm0, %v371_v7  ;;  %v380_v58 = vmul.f32 0.17677669, %v316_v50  ;;  %v398_v7 = vmul.f32 0.17677669, %v334_v63  ;;  %v341_v49 = vld [vmem:[%s4634_s26 + $0x120] sm:$0xff]  ;;  %v360_v63 = vld [vmem:[%s4634_s26 + $0x1b8] sm:$0xff] }
  0x58   : > { %3605 = vmatprep.mubr.msk.f32.mxu1 %vm561_vm0, %v387_v10  ;;  %4066 = vmatprep.subr.msk.bf16.mxu0 %vm4602_vm1, %v4064_v11  ;;  %v4082_v10 = vpack.c.bf16 %v474_v2, %v473_v1  ;;  %v357_v50 = vld [vmem:[%s4634_s26 + $0x1a0] sm:$0xff]  ;;  %v405_v52 = vmul.f32 0.17677669, %v341_v49 }
  0x59   : > { %3550 = vmatmul.mubr.msk.f32.gmra.mrb[2].mxu0 %vm561_vm0, %v372_v13  ;;  %4114 = vmatprep.subr.msk.bf16.mxu1 %vm4602_vm1, %v4112_v14  ;;  %v4130_v13 = vpack.c.bf16 %v490_v4, %v489_v3  ;;  %v345_v1 = vld [vmem:[%s4634_s26 + $0x140] sm:$0xff]  ;;  %v408_v3 = vmul.f32 0.17677669, %v344_v61  ;;  %v424_v4 = vmul.f32 0.17677669, %v360_v63  ;;  %v502_v63 = vld [vmem:[%s4936_s29 + $0x28] sm:$0xff] }
  0x5a   : > { %3606 = vmatmul.mubr.msk.f32.gmra.mrb[2].mxu1 %vm561_vm0, %v388_v15  ;;  %3552 = vmatprep.mubr.msk.f32.mxu0 %vm561_vm0, %v373_v16  ;;  %v353_v15 = vld [vmem:[%s4634_s26 + $0x180] sm:$0xff]  ;;  %v399_v16 = vmul.f32 0.17677669, %v335_v8  ;;  %v362_v8 = vld [vmem:[%s4634_s26 + $0x1c8] sm:$0xff] }
  0x5b   : > { %3608 = vmatprep.mubr.msk.f32.mxu1 %vm561_vm0, %v389_v18  ;;  %v417_v20 = vmul.f32 0.17677669, %v353_v15  ;;  %v361_v2 = vld [vmem:[%s4634_s26 + $0x1c0] sm:$0xff]  ;;  %v426_v12 = vmul.f32 0.17677669, %v362_v8 }
  0x5d   : > { %3553 = vmatmul.mubr.msk.f32.gmra.mrb[4].mxu0 %vm561_vm0, %v374_v22  ;;  %v476_v22 = vld [vmem:[%s4598_s23 + $0x158] sm:$0xff] }
  0x5e   : > { %4069 = vmatpush3.bf16.xpose.msk.msra.mxu0 %vm4602_vm1, %v4064_v11  ;;  %3609 = vmatmul.mubr.msk.f32.gmra.mrb[4].mxu1 %vm561_vm0, %v390_v26  ;;  %v336_v11 = vld [vmem:[%s4634_s26 + $0xf8] sm:$0xff]  ;;  %v4088_v25 = vpack.c.bf16 %v476_v22, %v475_v21  ;;  %v4136_v26 = vpack.c.bf16 %v492_v24, %v491_v23  ;;  %v350_v22 = vld [vmem:[%s4634_s26 + $0x168] sm:$0xff] }
  0x5f   : > { %4117 = vmatpush3.bf16.xpose.msk.msra.mxu1 %vm4602_vm1, %v4112_v14  ;;  %4072 = vmatprep.subr.msk.bf16.mxu0 %vm4602_vm1, %v4070_v29  ;;  %v383_v14 = vmul.f32 0.17677669, %v319_v6  ;;  %v400_v18 = vmul.f32 0.17677669, %v336_v11  ;;  %v346_v6 = vld [vmem:[%s4634_s26 + $0x148] sm:$0xff] }
  0x60   : > { %4120 = vmatprep.subr.msk.bf16.mxu1 %vm4602_vm1, %v4118_v32  ;;  %3555 = vmatprep.mubr.msk.f32.mxu0 %vm561_vm0, %v375_v33  ;;  %v479_v33 = vld [vmem:[%s4598_s23 + $0x170] sm:$0xff]  ;;  %v410_v11 = vmul.f32 0.17677669, %v346_v6  ;;  %v366_v24 = vld [vmem:[%s4634_s26 + $0x1e8] sm:$0xff]  ;;  %v414_v27 = vmul.f32 0.17677669, %v350_v22 }
  0x61   : > { %3611 = vmatprep.mubr.msk.f32.mxu1 %vm561_vm0, %v391_v35  ;;  %3556 = vmatmul.mubr.msk.f32.gmra.mrb[6].mxu0 %vm561_vm0, %v376_v36  ;;  %v495_v35 = vld [vmem:[%s4598_s23 + $0x1f0] sm:$0xff]  ;;  %v496_v36 = vld [vmem:[%s4598_s23 + $0x1f8] sm:$0xff]  ;;  %v430_v28 = vmul.f32 0.17677669, %v366_v24 }
  0x62   : > { %3612 = vmatmul.mubr.msk.f32.gmra.mrb[6].mxu1 %vm561_vm0, %v392_v37  ;;  %3558 = vmatprep.mubr.msk.f32.mxu0 %vm561_vm0, %v377_v38  ;;  %v4100_v37 = vpack.c.bf16 %v480_v34, %v479_v33  ;;  %v4148_v38 = vpack.c.bf16 %v496_v36, %v495_v35  ;;  %v498_v35 = vld [vmem:[%s4936_s29 + $0x8] sm:$0xff]  ;;  %v497_v36 = vld [vmem:[%s4936_s29] sm:$0xff] }
  0x63   : > { %3614 = vmatprep.mubr.msk.f32.mxu1 %vm561_vm0, %v393_v40  ;;  %v354_v40 = vld [vmem:[%s4634_s26 + $0x188] sm:$0xff] }
  0x64   : > { %v418_v44 = vmul.f32 0.17677669, %v354_v40 }
  0x65   : > { %3559 = vmatmul.mubr.msk.f32.gmra.mrb[8].mxu0 %vm561_vm0, %v378_v46  ;;  %v340_v46 = vld [vmem:[%s4634_s26 + $0x118] sm:$0xff] }
  0x66   : > { %4075 = vmatpush3.bf16.xpose.msk.msra.mxu0 %vm4602_vm1, %v4070_v29  ;;  %3615 = vmatmul.mubr.msk.f32.gmra.mrb[8].mxu1 %vm561_vm0, %v394_v48  ;;  %v493_v29 = vld [vmem:[%s4598_s23 + $0x1e0] sm:$0xff]  ;;  %v356_v48 = vld [vmem:[%s4634_s26 + $0x198] sm:$0xff] }
  0x67   : > { %4123 = vmatpush3.bf16.xpose.msk.msra.mxu1 %vm4602_vm1, %v4118_v32  ;;  %4078 = vmatprep.subr.msk.bf16.mxu0 %vm4602_vm1, %v4076_v51  ;;  %v4142_v32 = vpack.c.bf16 %v494_v30, %v493_v29  ;;  %v420_v0 = vmul.f32 0.17677669, %v356_v48  ;;  %v352_v30 = vld [vmem:[%s4634_s26 + $0x178] sm:$0xff] }
  0x68   : > { %4126 = vmatprep.subr.msk.bf16.mxu1 %vm4602_vm1, %v4124_v54  ;;  %3561 = vmatprep.mubr.msk.f32.mxu0 %vm561_vm0, %v379_v55  ;;  %v358_v55 = vld [vmem:[%s4634_s26 + $0x1a8] sm:$0xff]  ;;  %v416_v33 = vmul.f32 0.17677669, %v352_v30  ;;  %v500_v48 = vld [vmem:[%s4936_s29 + $0x18] sm:$0xff] }
  0x69   : > { %3617 = vmatprep.mubr.msk.f32.mxu1 %vm561_vm0, %v395_v57  ;;  %3562 = vmatmul.mubr.msk.f32.gmra.mrb[10].mxu0 %vm561_vm0, %v380_v58  ;;  %v359_v57 = vld [vmem:[%s4634_s26 + $0x1b0] sm:$0xff]  ;;  %v406_v58 = vmul.f32 0.17677669, %v342_v53 }
  0x6a   : > { %3618 = vmatmul.mubr.msk.f32.gmra.mrb[10].mxu1 %vm561_vm0, %v396_v59  ;;  %3564 = vmatprep.mubr.msk.f32.mxu0 %vm561_vm0, %v381_v60  ;;  %v422_v59 = vmul.f32 0.17677669, %v358_v55  ;;  %v407_v60 = vmul.f32 0.17677669, %v343_v56 }
  0x6b   : > { %3620 = vmatprep.mubr.msk.f32.mxu1 %vm561_vm0, %v397_v62  ;;  %v423_v62 = vmul.f32 0.17677669, %v359_v57  ;;  %v515_v57 = vld [vmem:[%s4936_s29 + $0x90] sm:$0xff] }
  0x6d   : > { %3565 = vmatmul.mubr.msk.f32.gmra.mrb[12].mxu0 %vm561_vm0, %v382_v5  ;;  %v409_v5 = vmul.f32 0.17677669, %v345_v1 }
  0x6e   : > { %4081 = vmatpush3.bf16.xpose.msk.msra.mxu0 %vm4602_vm1, %v4076_v51  ;;  %3621 = vmatmul.mubr.msk.f32.gmra.mrb[12].mxu1 %vm561_vm0, %v398_v7  ;;  %v404_v51 = vmul.f32 0.17677669, %v340_v46  ;;  %v425_v7 = vmul.f32 0.17677669, %v361_v2  ;;  %v516_v46 = vld [vmem:[%s4936_s29 + $0x98] sm:$0xff] }
  0x6f   : > { %4129 = vmatpush3.bf16.xpose.msk.msra.mxu1 %vm4602_vm1, %v4124_v54  ;;  %4084 = vmatprep.subr.msk.bf16.mxu0 %vm4602_vm1, %v4082_v10  ;;  %v421_v54 = vmul.f32 0.17677669, %v357_v50 }
  0x70   : > { %4132 = vmatprep.subr.msk.bf16.mxu1 %vm4602_vm1, %v4130_v13  ;;  %3567 = vmatprep.mubr.msk.f32.mxu0 %vm561_vm0, %v383_v14  ;;  %v348_v14 = vld [vmem:[%s4634_s26 + $0x158] sm:$0xff] }
  0x71   : > { %3623 = vmatprep.mubr.msk.f32.mxu1 %vm561_vm0, %v399_v16  ;;  %3568 = vmatmul.mubr.msk.f32.gmra.mrb[14].mxu0 %vm561_vm0, %v384_v17  ;;  %v364_v16 = vld [vmem:[%s4634_s26 + $0x1d8] sm:$0xff]  ;;  %v349_v17 = vld [vmem:[%s4634_s26 + $0x160] sm:$0xff] }
  0x72   : > { %3624 = vmatmul.mubr.msk.f32.gmra.mrb[14].mxu1 %vm561_vm0, %v400_v18  ;;  %3658 = vmatprep.mubr.msk.f32.mxu0 %vm561_vm0, %v401_v19  ;;  %v365_v18 = vld [vmem:[%s4634_s26 + $0x1e0] sm:$0xff]  ;;  %v412_v19 = vmul.f32 0.17677669, %v348_v14  ;;  %v413_v21 = vmul.f32 0.17677669, %v349_v17 }
  0x73   : > { %3714 = vmatprep.mubr.msk.f32.mxu1 %vm561_vm0, %v417_v20  ;;  %v428_v20 = vmul.f32 0.17677669, %v364_v16  ;;  %v429_v23 = vmul.f32 0.17677669, %v365_v18  ;;  %v504_v16 = vld [vmem:[%s4936_s29 + $0x38] sm:$0xff] }
  0x76   : > { %4087 = vmatpush3.bf16.xpose.msk.msra.mxu0 %vm4602_vm1, %v4082_v10  ;;  %v363_v10 = vld [vmem:[%s4634_s26 + $0x1d0] sm:$0xff] }
  0x77   : > { %4135 = vmatpush3.bf16.xpose.msk.msra.mxu1 %vm4602_vm1, %v4130_v13  ;;  %4090 = vmatprep.subr.msk.bf16.mxu0 %vm4602_vm1, %v4088_v25  ;;  %v411_v13 = vmul.f32 0.17677669, %v347_v9  ;;  %v427_v15 = vmul.f32 0.17677669, %v363_v10  ;;  %v517_v10 = vld [vmem:[%s4936_s29 + $0xa0] sm:$0xff] }
  0x78   : > { %4138 = vmatprep.subr.msk.bf16.mxu1 %vm4602_vm1, %v4136_v26 }
  0x7e   : > { %4093 = vmatpush3.bf16.xpose.msk.msra.mxu0 %vm4602_vm1, %v4088_v25  ;;  %v351_v25 = vld [vmem:[%s4634_s26 + $0x170] sm:$0xff] }
  0x7f   : > { %4141 = vmatpush3.bf16.xpose.msk.msra.mxu1 %vm4602_vm1, %v4136_v26  ;;  %4096 = vmatprep.subr.msk.bf16.mxu0 %vm4602_vm1, %v4094_v31  ;;  %v367_v26 = vld [vmem:[%s4634_s26 + $0x1f0] sm:$0xff]  ;;  %v415_v29 = vmul.f32 0.17677669, %v351_v25 }
  0x80   : > { %4144 = vmatprep.subr.msk.bf16.mxu1 %vm4602_vm1, %v4142_v32 }
  0x86   : > { %4099 = vmatpush3.bf16.xpose.msk.msra.mxu0 %vm4602_vm1, %v4094_v31  ;;  %v431_v31 = vmul.f32 0.17677669, %v367_v26  ;;  %v519_v26 = vld [vmem:[%s4936_s29 + $0xb0] sm:$0xff] }
  0x87   : > { %4147 = vmatpush3.bf16.xpose.msk.msra.mxu1 %vm4602_vm1, %v4142_v32  ;;  %4102 = vmatprep.subr.msk.bf16.mxu0 %vm4602_vm1, %v4100_v37  ;;  %v368_v32 = vld [vmem:[%s4634_s26 + $0x1f8] sm:$0xff] }
  0x88   : > { %4150 = vmatprep.subr.msk.bf16.mxu1 %vm4602_vm1, %v4148_v38  ;;  %v432_v34 = vmul.f32 0.17677669, %v368_v32  ;;  %v506_v32 = vld [vmem:[%s4936_s29 + $0x48] sm:$0xff] }
  0x8e   : > { %4105 = vmatpush3.bf16.xpose.msk.msra.mxu0 %vm4602_vm1, %v4100_v37 }
  0x8f   : > { %4153 = vmatpush3.bf16.xpose.msk.msra.mxu1 %vm4602_vm1, %v4148_v38 }
  0x95   : > { %3659 = vmatmul.mubr.msk.f32.vlgmr.msra.gmra.mrb[16].mxu0 %vm561_vm0, %v402_v43 }
  0x96   : > { %3715 = vmatmul.mubr.msk.f32.vlgmr.msra.gmra.mrb[16].mxu1 %vm561_vm0, %v418_v44  ;;  %3661 = vmatprep.mubr.msk.f32.mxu0 %vm561_vm0, %v403_v45  ;;  %v513_v44 = vld [vmem:[%s4936_s29 + $0x80] sm:$0xff] }
  0x97   : > { %3717 = vmatprep.mubr.msk.f32.mxu1 %vm561_vm0, %v419_v47 }
  0x99   : > { %3662 = vmatmul.mubr.msk.f32.gmra.mrb[18].mxu0 %vm561_vm0, %v404_v51 }
  0x9a   : > { %3718 = vmatmul.mubr.msk.f32.gmra.mrb[18].mxu1 %vm561_vm0, %v420_v0  ;;  %3664 = vmatprep.mubr.msk.f32.mxu0 %vm561_vm0, %v405_v52 }
  0x9b   : > { %3720 = vmatprep.mubr.msk.f32.mxu1 %vm561_vm0, %v421_v54 }
  0x9d   : > { %3665 = vmatmul.mubr.msk.f32.gmra.mrb[20].mxu0 %vm561_vm0, %v406_v58 }
  0x9e   : > { %3721 = vmatmul.mubr.msk.f32.gmra.mrb[20].mxu1 %vm561_vm0, %v422_v59  ;;  %3667 = vmatprep.mubr.msk.f32.mxu0 %vm561_vm0, %v407_v60  ;;  %v499_v59 = vld [vmem:[%s4936_s29 + $0x10] sm:$0xff]  ;;  %v518_v60 = vld [vmem:[%s4936_s29 + $0xa8] sm:$0xff] }
  0x9f   : > { %3723 = vmatprep.mubr.msk.f32.mxu1 %vm561_vm0, %v423_v62 }
  0xa1   : > { %3668 = vmatmul.mubr.msk.f32.gmra.mrb[22].mxu0 %vm561_vm0, %v408_v3 }
  0xa2   : > { %3724 = vmatmul.mubr.msk.f32.gmra.mrb[22].mxu1 %vm561_vm0, %v424_v4  ;;  %3670 = vmatprep.mubr.msk.f32.mxu0 %vm561_vm0, %v409_v5 }
  0xa3   : > { %3726 = vmatprep.mubr.msk.f32.mxu1 %vm561_vm0, %v425_v7 }
  0xa5   : > { %3671 = vmatmul.mubr.msk.f32.gmra.mrb[24].mxu0 %vm561_vm0, %v410_v11 }
  0xa6   : > { %3727 = vmatmul.mubr.msk.f32.gmra.mrb[24].mxu1 %vm561_vm0, %v426_v12  ;;  %3673 = vmatprep.mubr.msk.f32.mxu0 %vm561_vm0, %v411_v13  ;;  %v501_v12 = vld [vmem:[%s4936_s29 + $0x20] sm:$0xff]  ;;  %v520_v13 = vld [vmem:[%s4936_s29 + $0xb8] sm:$0xff] }
  0xa7   : > { %3729 = vmatprep.mubr.msk.f32.mxu1 %vm561_vm0, %v427_v15 }
  0xa9   : > { %3674 = vmatmul.mubr.msk.f32.gmra.mrb[26].mxu0 %vm561_vm0, %v412_v19 }
  0xaa   : > { %3730 = vmatmul.mubr.msk.f32.gmra.mrb[26].mxu1 %vm561_vm0, %v428_v20  ;;  %3676 = vmatprep.mubr.msk.f32.mxu0 %vm561_vm0, %v413_v21 }
  0xab   : > { %3732 = vmatprep.mubr.msk.f32.mxu1 %vm561_vm0, %v429_v23 }
  0xad   : > { %3677 = vmatmul.mubr.msk.f32.gmra.mrb[28].mxu0 %vm561_vm0, %v414_v27 }
  0xae   : > { %3733 = vmatmul.mubr.msk.f32.gmra.mrb[28].mxu1 %vm561_vm0, %v430_v28  ;;  %3679 = vmatprep.mubr.msk.f32.mxu0 %vm561_vm0, %v415_v29  ;;  %v503_v28 = vld [vmem:[%s4936_s29 + $0x30] sm:$0xff]  ;;  %v522_v29 = vld [vmem:[%s4936_s29 + $0xc8] sm:$0xff] }
  0xaf   : > { %3735 = vmatprep.mubr.msk.f32.mxu1 %vm561_vm0, %v431_v31 }
  0xb1   : > { %3680 = vmatmul.mubr.msk.f32.gmra.mrb[30].mxu0 %vm561_vm0, %v416_v33 }
  0xb2   : > { %3736 = vmatmul.mubr.msk.f32.gmra.mrb[30].mxu1 %vm561_vm0, %v432_v34 }
 0x128   : > { %v3548_v37 = vpop.f32.mrb[0].mxu0 }
 0x129   : > { %v4940_v38 = vadd.f32 %v3548_v37, %v498_v35  ;;  %v724_v39 = vpop.f32.mrb[1].mxu0  ;;  %v3604_v40 = vpop.f32.mrb[0].mxu1 }
 0x12a   : > { %v4942_v41 = vadd.f32 %v724_v39, %v497_v36  ;;  %v965_v43 = vpop.f32.mrb[1].mxu1  ;;  %v4949_v47 = vadd.f32 %v3604_v40, %v514_v42  ;;  %v521_v40 = vld [vmem:[%s4936_s29 + $0xc0] sm:$0xff] }
 0x12b   : > { %1528 = vmax.xlane.f32.xlu1 %v4940_v38  ;;  %v4952_v51 = vadd.f32 %v965_v43, %v513_v44  ;;  %v505_v42 = vld [vmem:[%s4936_s29 + $0x40] sm:$0xff]  ;;  %v524_v43 = vld [vmem:[%s4936_s29 + $0xd8] sm:$0xff] }
 0x12c   : > { %1526 = vmax.xlane.f32.xlu0 %v4942_v41  ;;  %v3551_v45 = vpop.f32.mrb[2].mxu0 }
 0x12d   : > { %v3607_v49 = vpop.f32.mrb[2].mxu1  ;;  %v734_v50 = vpop.f32.mrb[3].mxu0  ;;  %v4957_v53 = vadd.f32 %v3551_v45, %v500_v48  ;;  %v508_v45 = vld [vmem:[%s4936_s29 + $0x58] sm:$0xff] }
 0x12e   : > { %v975_v0 = vpop.f32.mrb[3].mxu1  ;;  %v4955_v52 = vadd.f32 %v3607_v49, %v516_v46  ;;  %v4968_v3 = vadd.f32 %v734_v50, %v499_v59  ;;  %v523_v50 = vld [vmem:[%s4936_s29 + $0xd0] sm:$0xff] }
 0x12f   : > { %1560 = vmax.xlane.f32.xlu1 %v4949_v47  ;;  %v4965_v62 = vadd.f32 %v975_v0, %v515_v57  ;;  %v507_v0 = vld [vmem:[%s4936_s29 + $0x50] sm:$0xff] }
 0x130   : > { %1558 = vmax.xlane.f32.xlu0 %v4952_v51  ;;  %v3554_v54 = vpop.f32.mrb[4].mxu0 }
 0x131   : > { %v3610_v55 = vpop.f32.mrb[4].mxu1  ;;  %v744_v56 = vpop.f32.mrb[5].mxu0  ;;  %v4973_v6 = vadd.f32 %v3554_v54, %v502_v63  ;;  %v526_v54 = vld [vmem:[%s4936_s29 + $0xe8] sm:$0xff]  ;;  %v528_v63 = vld [vmem:[%s4936_s29 + $0xf8] sm:$0xff] }
 0x132   : > { %v985_v58 = vpop.f32.mrb[5].mxu1  ;;  %v4971_v5 = vadd.f32 %v3610_v55, %v518_v60  ;;  %v4984_v19 = vadd.f32 %v744_v56, %v501_v12  ;;  %v510_v56 = vld [vmem:[%s4936_s29 + $0x68] sm:$0xff]  ;;  %v525_v60 = vld [vmem:[%s4936_s29 + $0xe0] sm:$0xff] }
 0x133   : > { %1564 = vmax.xlane.f32.xlu1 %v4955_v52  ;;  %v4981_v15 = vadd.f32 %v985_v58, %v517_v10  ;;  %v511_v10 = vld [vmem:[%s4936_s29 + $0x70] sm:$0xff] }
 0x134   : > { %1532 = vmax.xlane.f32.xlu0 %v4957_v53  ;;  %v3557_v61 = vpop.f32.mrb[6].mxu0 }
 0x135   : > { %v3613_v1 = vpop.f32.mrb[6].mxu1  ;;  %v754_v2 = vpop.f32.mrb[7].mxu0  ;;  %v4989_v22 = vadd.f32 %v3557_v61, %v504_v16  ;;  %v509_v61 = vld [vmem:[%s4936_s29 + $0x60] sm:$0xff] }
 0x136   : > { %v995_v4 = vpop.f32.mrb[7].mxu1  ;;  %v4987_v21 = vadd.f32 %v3613_v1, %v520_v13  ;;  %v5000_v35 = vadd.f32 %v754_v2, %v503_v28  ;;  %v512_v2 = vld [vmem:[%s4936_s29 + $0x78] sm:$0xff]  ;;  %v530_v13 = vld [vmem:[%s4936_s29 + $0x108] sm:$0xff] }
 0x137   : > { %1562 = vmax.xlane.f32.xlu1 %v4965_v62  ;;  %v4997_v31 = vadd.f32 %v995_v4, %v519_v26  ;;  %v545_v26 = vld [vmem:[%s4936_s29 + $0x180] sm:$0xff]  ;;  %v532_v28 = vld [vmem:[%s4936_s29 + $0x118] sm:$0xff] }
 0x138   : > { %1530 = vmax.xlane.f32.xlu0 %v4968_v3  ;;  %v3560_v7 = vpop.f32.mrb[8].mxu0 }
 0x139   : > { %v3616_v8 = vpop.f32.mrb[8].mxu1  ;;  %v764_v9 = vpop.f32.mrb[9].mxu0  ;;  %v5005_v39 = vadd.f32 %v3560_v7, %v506_v32 }
 0x13a   : > { %v1005_v11 = vpop.f32.mrb[9].mxu1  ;;  %v5003_v37 = vadd.f32 %v3616_v8, %v522_v29  ;;  %v5016_v46 = vadd.f32 %v764_v9, %v505_v42  ;;  %v527_v9 = vld [vmem:[%s4936_s29 + $0xf0] sm:$0xff]  ;;  %v548_v29 = vld [vmem:[%s4936_s29 + $0x198] sm:$0xff] }
 0x13b   : > { %1568 = vmax.xlane.f32.xlu1 %v4971_v5  ;;  %v5013_v44 = vadd.f32 %v1005_v11, %v521_v40 }
 0x13c   : > { %1536 = vmax.xlane.f32.xlu0 %v4973_v6  ;;  %v3563_v14 = vpop.f32.mrb[10].mxu0 }
 0x13d   : > { %v3619_v17 = vpop.f32.mrb[10].mxu1  ;;  %v774_v18 = vpop.f32.mrb[11].mxu0  ;;  %v5021_v49 = vadd.f32 %v3563_v14, %v508_v45  ;;  %v546_v14 = vld [vmem:[%s4936_s29 + $0x188] sm:$0xff] }
 0x13e   : > { %v1015_v20 = vpop.f32.mrb[11].mxu1  ;;  %v5019_v48 = vadd.f32 %v3619_v17, %v524_v43  ;;  %v5032_v57 = vadd.f32 %v774_v18, %v507_v0 }
 0x13f   : > { %1566 = vmax.xlane.f32.xlu1 %v4981_v15  ;;  %v5029_v55 = vadd.f32 %v1015_v20, %v523_v50 }
 0x140   : > { %1534 = vmax.xlane.f32.xlu0 %v4984_v19  ;;  %v3566_v23 = vpop.f32.mrb[12].mxu0 }
 0x141   : > { %v3622_v24 = vpop.f32.mrb[12].mxu1  ;;  %v784_v25 = vpop.f32.mrb[13].mxu0  ;;  %v5037_v59 = vadd.f32 %v3566_v23, %v510_v56  ;;  %v547_v56 = vld [vmem:[%s4936_s29 + $0x190] sm:$0xff] }
 0x142   : > { %v1025_v27 = vpop.f32.mrb[13].mxu1  ;;  %v5035_v58 = vadd.f32 %v3622_v24, %v526_v54  ;;  %v5048_v4 = vadd.f32 %v784_v25, %v509_v61  ;;  %v529_v25 = vld [vmem:[%s4936_s29 + $0x100] sm:$0xff]  ;;  %v531_v54 = vld [vmem:[%s4936_s29 + $0x110] sm:$0xff]  ;;  %v534_v61 = vld [vmem:[%s4936_s29 + $0x128] sm:$0xff] }
 0x143   : > { %1572 = vmax.xlane.f32.xlu1 %v4987_v21  ;;  %v5045_v1 = vadd.f32 %v1025_v27, %v525_v60 }
 0x144   : > { %1540 = vmax.xlane.f32.xlu0 %v4989_v22  ;;  %v3569_v30 = vpop.f32.mrb[14].mxu0 }
 0x145   : > { %v3625_v33 = vpop.f32.mrb[14].mxu1  ;;  %v794_v34 = vpop.f32.mrb[15].mxu0  ;;  %v5053_v8 = vadd.f32 %v3569_v30, %v512_v2 }
 0x146   : > { %v1035_v36 = vpop.f32.mrb[15].mxu1  ;;  %v5051_v7 = vadd.f32 %v3625_v33, %v528_v63  ;;  %v5062_v12 = vadd.f32 %v794_v34, %v511_v10  ;;  %v550_v63 = vld [vmem:[%s4936_s29 + $0x1a8] sm:$0xff] }
 0x147   : > { %1570 = vmax.xlane.f32.xlu1 %v4997_v31  ;;  %v5060_v11 = vadd.f32 %v1035_v36, %v527_v9 }
 0x148   : > { %1538 = vmax.xlane.f32.xlu0 %v5000_v35 }
 0x14b   : > { %1576 = vmax.xlane.f32.xlu1 %v5003_v37 }
 0x14c   : > { %1544 = vmax.xlane.f32.xlu0 %v5005_v39 }
 0x14f   : > { %1574 = vmax.xlane.f32.xlu1 %v5013_v44 }
 0x150   : > { %1542 = vmax.xlane.f32.xlu0 %v5016_v46 }
 0x153   : > { %1580 = vmax.xlane.f32.xlu1 %v5019_v48 }
 0x154   : > { %1548 = vmax.xlane.f32.xlu0 %v5021_v49 }
 0x157   : > { %1578 = vmax.xlane.f32.xlu1 %v5029_v55 }
 0x158   : > { %1546 = vmax.xlane.f32.xlu0 %v5032_v57 }
 0x15b   : > { %1584 = vmax.xlane.f32.xlu1 %v5035_v58 }
 0x15c   : > { %1552 = vmax.xlane.f32.xlu0 %v5037_v59 }
 0x15f   : > { %1582 = vmax.xlane.f32.xlu1 %v5045_v1 }
 0x160   : > { %1550 = vmax.xlane.f32.xlu0 %v5048_v4 }
 0x163   : > { %1588 = vmax.xlane.f32.xlu1 %v5051_v7 }
 0x164   : > { %1556 = vmax.xlane.f32.xlu0 %v5053_v8 }
 0x167   : > { %1586 = vmax.xlane.f32.xlu1 %v5060_v11 }
 0x168   : > { %v3660_v16 = vpop.f32.mrb[16].mxu0  ;;  %1554 = vmax.xlane.f32.xlu0 %v5062_v12 }
 0x169   : > { %v5068_v17 = vadd.f32 %v3660_v16, %v530_v13  ;;  %v3716_v18 = vpop.f32.mrb[16].mxu1  ;;  %v1206_v20 = vpop.f32.mrb[17].mxu0 }
 0x16a   : > { %v5070_v23 = vadd.f32 %v3716_v18, %v546_v14  ;;  %v1447_v24 = vpop.f32.mrb[17].mxu1  ;;  %v5078_v33 = vadd.f32 %v1206_v20, %v529_v25 }
 0x16b   : > { %v5080_v34 = vadd.f32 %v1447_v24, %v545_v26 }
 0x16c   : > { %1624 = vmax.xlane.f32.xlu1 %v5070_v23  ;;  %1592 = vmax.xlane.f32.xlu0 %v5068_v17  ;;  %v3663_v27 = vpop.f32.mrb[18].mxu0 }
 0x16d   : > { %v3719_v30 = vpop.f32.mrb[18].mxu1  ;;  %v1216_v32 = vpop.f32.mrb[19].mxu0  ;;  %v5083_v40 = vadd.f32 %v3663_v27, %v532_v28  ;;  %v533_v27 = vld [vmem:[%s4936_s29 + $0x120] sm:$0xff] }
 0x16e   : > { %v1457_v36 = vpop.f32.mrb[19].mxu1  ;;  %v5085_v42 = vadd.f32 %v3719_v30, %v548_v29  ;;  %v5094_v10 = vadd.f32 %v1216_v32, %v531_v54  ;;  %v549_v28 = vld [vmem:[%s4936_s29 + $0x1a0] sm:$0xff]  ;;  %v536_v30 = vld [vmem:[%s4936_s29 + $0x138] sm:$0xff] }
 0x16f   : > { %5843 = vst [vmem:[#allocation2_spill] sm:$0xff] %v5083_v40  ;;  %v5096_v13 = vadd.f32 %v1457_v36, %v547_v56  ;;  %v552_v32 = vld [vmem:[%s4936_s29 + $0x1b8] sm:$0xff] }
 0x170   : > { %1622 = vmax.xlane.f32.xlu1 %v5080_v34  ;;  %5844 = vst [vmem:[#allocation3_spill] sm:$0xff] %v5085_v42  ;;  %1590 = vmax.xlane.f32.xlu0 %v5078_v33  ;;  %v3666_v43 = vpop.f32.mrb[20].mxu0  ;;  %5845 = vst [vmem:[#allocation4_spill] sm:$0xff] %v5094_v10 }
 0x171   : > { %v3722_v45 = vpop.f32.mrb[20].mxu1  ;;  %v1226_v50 = vpop.f32.mrb[21].mxu0  ;;  %5846 = vst [vmem:[#allocation5_spill] sm:$0xff] %v5096_v13  ;;  %v5099_v16 = vadd.f32 %v3666_v43, %v534_v61 }
 0x172   : > { %v1467_v0 = vpop.f32.mrb[21].mxu1  ;;  %v5101_v18 = vadd.f32 %v3722_v45, %v550_v63  ;;  %v5110_v45 = vadd.f32 %v1226_v50, %v533_v27  ;;  %v551_v50 = vld [vmem:[%s4936_s29 + $0x1b0] sm:$0xff] }
 0x173   : > { %5847 = vst [vmem:[#allocation6_spill] sm:$0xff] %v5099_v16  ;;  %v5112_v54 = vadd.f32 %v1467_v0, %v549_v28 }
 0x174   : > { %1628 = vmax.xlane.f32.xlu1 %v5085_v42  ;;  %1596 = vmax.xlane.f32.xlu0 %v5083_v40  ;;  %v3669_v60 = vpop.f32.mrb[22].mxu0  ;;  %5848 = vst [vmem:[#allocation7_spill] sm:$0xff] %v5101_v18  ;;  %5849 = vst [vmem:[#allocation8_spill] sm:$0xff] %v5110_v45  ;;  %v535_v40 = vld [vmem:[%s4936_s29 + $0x130] sm:$0xff]  ;;  %v553_v42 = vld [vmem:[%s4936_s29 + $0x1c0] sm:$0xff] }
 0x175   : > { %v3725_v2 = vpop.f32.mrb[22].mxu1  ;;  %v1236_v9 = vpop.f32.mrb[23].mxu0  ;;  %5850 = vst [vmem:[#allocation9_spill] sm:$0xff] %v5112_v54  ;;  %v5115_v61 = vadd.f32 %v3669_v60, %v536_v30  ;;  %v538_v60 = vld [vmem:[%s4936_s29 + $0x148] sm:$0xff] }
 0x176   : > { %v1477_v14 = vpop.f32.mrb[23].mxu1  ;;  %v5117_v63 = vadd.f32 %v3725_v2, %v552_v32  ;;  %v554_v2 = vld [vmem:[%s4936_s29 + $0x1c8] sm:$0xff]  ;;  %v5126_v30 = vadd.f32 %v1236_v9, %v535_v40  ;;  %v540_v40 = vld [vmem:[%s4936_s29 + $0x158] sm:$0xff] }
 0x177   : > { %5851 = vst [vmem:[#allocation10_spill] sm:$0xff] %v5115_v61  ;;  %v5128_v32 = vadd.f32 %v1477_v14, %v551_v50  ;;  %v556_v9 = vld [vmem:[%s4936_s29 + $0x1d8] sm:$0xff] }
 0x178   : > { %1626 = vmax.xlane.f32.xlu1 %v5096_v13  ;;  %1594 = vmax.xlane.f32.xlu0 %v5094_v10  ;;  %v3672_v20 = vpop.f32.mrb[24].mxu0  ;;  %5852 = vst [vmem:[#allocation11_spill] sm:$0xff] %v5117_v63 }
 0x179   : > { %v3728_v24 = vpop.f32.mrb[24].mxu1  ;;  %v1246_v25 = vpop.f32.mrb[25].mxu0 }
 0x17a   : > { %v1487_v26 = vpop.f32.mrb[25].mxu1 }
 0x17b   : > { %v5144_v50 = vadd.f32 %v1487_v26, %v553_v42  ;;  %v542_v42 = vld [vmem:[%s4936_s29 + $0x168] sm:$0xff] }
 0x17c   : > { %1632 = vmax.xlane.f32.xlu1 %v5101_v18  ;;  %1600 = vmax.xlane.f32.xlu0 %v5099_v16  ;;  %v3675_v29 = vpop.f32.mrb[26].mxu0 }
 0x17d   : > { %v3731_v36 = vpop.f32.mrb[26].mxu1  ;;  %v1256_v43 = vpop.f32.mrb[27].mxu0 }
 0x17e   : > { %v1497_v56 = vpop.f32.mrb[27].mxu1 }
 0x180   : > { %1630 = vmax.xlane.f32.xlu1 %v5112_v54  ;;  %1598 = vmax.xlane.f32.xlu0 %v5110_v45  ;;  %v3678_v16 = vpop.f32.mrb[28].mxu0  ;;  %v5131_v54 = vadd.f32 %v3672_v20, %v538_v60  ;;  %v5147_v20 = vadd.f32 %v3675_v29, %v540_v40  ;;  %v539_v60 = vld [vmem:[%s4936_s29 + $0x150] sm:$0xff]  ;;  %v541_v40 = vld [vmem:[%s4936_s29 + $0x160] sm:$0xff] }
 0x181   : > { %v3734_v18 = vpop.f32.mrb[28].mxu1  ;;  %v1266_v10 = vpop.f32.mrb[29].mxu0  ;;  %v5158_v26 = vadd.f32 %v1256_v43, %v539_v60  ;;  %v5163_v29 = vadd.f32 %v3678_v16, %v542_v42  ;;  %v544_v43 = vld [vmem:[%s4936_s29 + $0x178] sm:$0xff]  ;;  %v543_v42 = vld [vmem:[%s4936_s29 + $0x170] sm:$0xff] }
 0x182   : > { %v1507_v13 = vpop.f32.mrb[29].mxu1  ;;  %v560_v60 = vld [vmem:[%s4936_s29 + $0x1f8] sm:$0xff] }
 0x183   : > { %5853 = vst [vmem:[#allocation12_spill] sm:$0xff] %v5163_v29 }
 0x184   : > { %1636 = vmax.xlane.f32.xlu1 %v5117_v63  ;;  %1604 = vmax.xlane.f32.xlu0 %v5115_v61  ;;  %v3681_v0 = vpop.f32.mrb[30].mxu0  ;;  %v5133_v63 = vadd.f32 %v3728_v24, %v554_v2  ;;  %v537_v61 = vld [vmem:[%s4936_s29 + $0x140] sm:$0xff]  ;;  %v5149_v24 = vadd.f32 %v3731_v36, %v556_v9  ;;  %v555_v2 = vld [vmem:[%s4936_s29 + $0x1d0] sm:$0xff] }
 0x185   : > { %v3737_v27 = vpop.f32.mrb[30].mxu1  ;;  %v1276_v28 = vpop.f32.mrb[31].mxu0  ;;  %v5142_v14 = vadd.f32 %v1246_v25, %v537_v61  ;;  %v558_v25 = vld [vmem:[%s4936_s29 + $0x1e8] sm:$0xff]  ;;  %v5160_v61 = vadd.f32 %v1497_v56, %v555_v2  ;;  %v557_v9 = vld [vmem:[%s4936_s29 + $0x1e0] sm:$0xff]  ;;  %v5174_v56 = vadd.f32 %v1266_v10, %v541_v40  ;;  %v5179_v16 = vadd.f32 %v3681_v0, %v544_v43 }
 0x186   : > { %v1517_v45 = vpop.f32.mrb[31].mxu1  ;;  %v5165_v36 = vadd.f32 %v3734_v18, %v558_v25  ;;  %v5176_v2 = vadd.f32 %v1507_v13, %v557_v9  ;;  %v5181_v18 = vadd.f32 %v3737_v27, %v560_v60  ;;  %v559_v25 = vld [vmem:[%s4936_s29 + $0x1f0] sm:$0xff] }
 0x187   : > { %5854 = vst [vmem:[#allocation13_spill] sm:$0xff] %v5179_v16  ;;  %v5190_v10 = vadd.f32 %v1517_v45, %v559_v25 }
 0x188   : > { %1634 = vmax.xlane.f32.xlu1 %v5128_v32  ;;  %1602 = vmax.xlane.f32.xlu0 %v5126_v30 }
 0x18c   : > { %1640 = vmax.xlane.f32.xlu1 %v5133_v63  ;;  %1608 = vmax.xlane.f32.xlu0 %v5131_v54 }
 0x190   : > { %1638 = vmax.xlane.f32.xlu1 %v5144_v50  ;;  %1606 = vmax.xlane.f32.xlu0 %v5142_v14 }
 0x194   : > { %1644 = vmax.xlane.f32.xlu1 %v5149_v24  ;;  %1612 = vmax.xlane.f32.xlu0 %v5147_v20 }
 0x198   : > { %1642 = vmax.xlane.f32.xlu1 %v5160_v61  ;;  %1610 = vmax.xlane.f32.xlu0 %v5158_v26 }
 0x19c   : > { %1648 = vmax.xlane.f32.xlu1 %v5165_v36  ;;  %1616 = vmax.xlane.f32.xlu0 %v5163_v29  ;;  %v5188_v29 = vadd.f32 %v1276_v28, %v543_v42 }
 0x19e   : > { %5855 = vst [vmem:[#allocation14_spill] sm:$0xff] %v5188_v29 }
 0x1a0   : > { %1646 = vmax.xlane.f32.xlu1 %v5176_v2  ;;  %1614 = vmax.xlane.f32.xlu0 %v5174_v56 }
 0x1a4   : > { %1652 = vmax.xlane.f32.xlu1 %v5181_v18  ;;  %1620 = vmax.xlane.f32.xlu0 %v5179_v16 }
 0x1a8   : > { %1650 = vmax.xlane.f32.xlu1 %v5190_v10  ;;  %1618 = vmax.xlane.f32.xlu0 %v5188_v29 }
 0x1b8   : > { %v1529_v13 = vpop.xlane.xlu1 %1528 }
 0x1b9   : > { %v1655_v0 = vsub.f32 %v4940_v38, %v1529_v13  ;;  %v1527_v27 = vpop.xlane.xlu0 %1526 }
 0x1ba   : > { %v1654_v40 = vsub.f32 %v4942_v41, %v1527_v27 }
 0x1bb   : > { %v1720_v9 = vmul.f32 1.442695, %v1655_v0 }
 0x1bc   : > { %v1718_v43 = vmul.f32 1.442695, %v1654_v40  ;;  %v1561_v60 = vpop.xlane.xlu1 %1560 }
 0x1bd   : > { %4290 = vpow2.f32 %v1720_v9  ;;  %v1671_v16 = vsub.f32 %v4949_v47, %v1561_v60  ;;  %v1559_v28 = vpop.xlane.xlu0 %1558 }
 0x1be   : > { %v1670_v45 = vsub.f32 %v4952_v51, %v1559_v28  ;;  %4292 = vpow2.f32 %v1718_v43 }
 0x1bf   : > { %v1752_v42 = vmul.f32 1.442695, %v1671_v16 }
 0x1c0   : > { %v1565_v25 = vpop.xlane.xlu1 %1564  ;;  %v1750_v29 = vmul.f32 1.442695, %v1670_v45 }
 0x1c1   : > { %4294 = vpow2.f32 %v1752_v42  ;;  %v1673_v38 = vsub.f32 %v4955_v52, %v1565_v25  ;;  %v1533_v13 = vpop.xlane.xlu0 %1532  ;;  %v2296_v25 = vld [vmem:[%s5208_s7 + $0x10] sm:$0xff] }
 0x1c2   : > { %v1657_v41 = vsub.f32 %v4957_v53, %v1533_v13  ;;  %4296 = vpow2.f32 %v1750_v29  ;;  %v2295_v29 = vld [vmem:[%s5208_s7 + $0x8] sm:$0xff]  ;;  %v2310_v13 = vld [vmem:[%s5208_s7 + $0x80] sm:$0xff] }
 0x1c3   : > { %v1756_v40 = vmul.f32 1.442695, %v1673_v38  ;;  %v2297_v38 = vld [vmem:[%s5208_s7 + $0x18] sm:$0xff] }
 0x1c4   : > { %v1724_v0 = vmul.f32 1.442695, %v1657_v41  ;;  %v1563_v27 = vpop.xlane.xlu1 %1562 }
 0x1c5   : > { %v1672_v47 = vsub.f32 %v4965_v62, %v1563_v27  ;;  %v1531_v9 = vpop.xlane.xlu0 %1530  ;;  %v2294_v62 = vld [vmem:[%s5208_s7] sm:$0xff]  ;;  %v2311_v27 = vld [vmem:[%s5208_s7 + $0x88] sm:$0xff] }
 0x1c6   : > { %4298 = vpow2.f32 %v1724_v0  ;;  %v1656_v51 = vsub.f32 %v4968_v3, %v1531_v9  ;;  %v4154_v28 = vpack.c.bf16 %v2295_v29, %v2294_v62  ;;  %v4158_v0 = vpack.c.bf16 %v2297_v38, %v2296_v25 }
 0x1c7   : > { %v5202_v16 = vpop.eup %4290  ;;  %4300 = vpow2.f32 %v1756_v40  ;;  %v1754_v3 = vmul.f32 1.442695, %v1672_v47  ;;  %v2298_v40 = vld [vmem:[%s5208_s7 + $0x20] sm:$0xff]  ;;  %v2299_v47 = vld [vmem:[%s5208_s7 + $0x28] sm:$0xff] }
 0x1c8   : > { %v1722_v52 = vmul.f32 1.442695, %v1656_v51  ;;  %v1569_v53 = vpop.xlane.xlu1 %1568  ;;  %1848 = vadd.xlane.f32.xlu0 %v5202_v16  ;;  %v5214_v45 = vpop.eup %4292  ;;  %4155 = vmatprep.subr.bf16.mxu0 %v4154_v28  ;;  %v4186_v51 = vpack.c.bf16 %v2311_v27, %v2310_v13 }
 0x1c9   : > { %v1675_v43 = vsub.f32 %v4971_v5, %v1569_v53  ;;  %v1537_v60 = vpop.xlane.xlu0 %1536  ;;  %4157 = vmatpush3.bf16.msra.mxu0 %v4154_v28 }
 0x1ca   : > { %4302 = vpow2.f32 %v1722_v52  ;;  %v1659_v42 = vsub.f32 %v4973_v6, %v1537_v60  ;;  %v2312_v52 = vld [vmem:[%s5208_s7 + $0x90] sm:$0xff]  ;;  %v2313_v6 = vld [vmem:[%s5208_s7 + $0x98] sm:$0xff]  ;;  %4159 = vmatprep.subr.bf16.mxu0 %v4158_v0  ;;  %4187 = vmatprep.subr.bf16.mxu1 %v4186_v51 }
 0x1cb   : > { %v5220_v41 = vpop.eup %4294  ;;  %4304 = vpow2.f32 %v1754_v3  ;;  %v1760_v53 = vmul.f32 1.442695, %v1675_v43  ;;  %v4190_v60 = vpack.c.bf16 %v2313_v6, %v2312_v52  ;;  %4189 = vmatpush3.bf16.msra.mxu1 %v4186_v51  ;;  %v2314_v51 = vld [vmem:[%s5208_s7 + $0xa0] sm:$0xff] }
 0x1cc   : > { %5856 = vst [vmem:[#allocation15_spill] sm:$0xff] %v5220_v41  ;;  %v1728_v5 = vmul.f32 1.442695, %v1659_v42  ;;  %1880 = vadd.xlane.f32.xlu1 %v5220_v41  ;;  %v1567_v9 = vpop.xlane.xlu1 %1566  ;;  %1846 = vadd.xlane.f32.xlu0 %v5214_v45  ;;  %v4162_v42 = vpack.c.bf16 %v2299_v47, %v2298_v40  ;;  %v5231_v38 = vpop.eup %4296 }
 0x1cd   : > { %v1674_v62 = vsub.f32 %v4981_v15, %v1567_v9  ;;  %v1535_v29 = vpop.xlane.xlu0 %1534  ;;  %4191 = vmatprep.subr.bf16.mxu1 %v4190_v60  ;;  %4161 = vmatpush3.bf16.msra.mxu0 %v4158_v0  ;;  %v2300_v9 = vld [vmem:[%s5208_s7 + $0x30] sm:$0xff] }
 0x1ce   : > { %4306 = vpow2.f32 %v1728_v5  ;;  %v1658_v25 = vsub.f32 %v4984_v19, %v1535_v29  ;;  %4163 = vmatprep.subr.bf16.mxu0 %v4162_v42 }
 0x1cf   : > { %4308 = vpow2.f32 %v1760_v53  ;;  %v1758_v15 = vmul.f32 1.442695, %v1674_v62  ;;  %4193 = vmatpush3.bf16.msra.mxu1 %v4190_v60  ;;  %v2315_v53 = vld [vmem:[%s5208_s7 + $0xa8] sm:$0xff] }
 0x1d0   : > { %v5233_v41 = vpop.eup %4298  ;;  %v1726_v13 = vmul.f32 1.442695, %v1658_v25  ;;  %v1573_v27 = vpop.xlane.xlu1 %1572  ;;  %1878 = vadd.xlane.f32.xlu1 %v5231_v38  ;;  %v4194_v29 = vpack.c.bf16 %v2315_v53, %v2314_v51 }
 0x1d1   : > { %v1677_v19 = vsub.f32 %v4987_v21, %v1573_v27  ;;  %1852 = vadd.xlane.f32.xlu0 %v5233_v41  ;;  %v1541_v3 = vpop.xlane.xlu0 %1540  ;;  %v5239_v28 = vpop.eup %4300  ;;  %v2301_v21 = vld [vmem:[%s5208_s7 + $0x38] sm:$0xff]  ;;  %4165 = vmatpush3.bf16.msra.mxu0 %v4162_v42  ;;  %v2302_v27 = vld [vmem:[%s5208_s7 + $0x40] sm:$0xff]  ;;  %v2316_v42 = vld [vmem:[%s5208_s7 + $0xb0] sm:$0xff] }
 0x1d2   : > { %4310 = vpow2.f32 %v1726_v13  ;;  %v1661_v43 = vsub.f32 %v4989_v22, %v1541_v3  ;;  %v4166_v6 = vpack.c.bf16 %v2301_v21, %v2300_v9  ;;  %4195 = vmatprep.subr.bf16.mxu1 %v4194_v29 }
 0x1d3   : > { %4312 = vpow2.f32 %v1758_v15  ;;  %v1764_v52 = vmul.f32 1.442695, %v1677_v19  ;;  %v2303_v15 = vld [vmem:[%s5208_s7 + $0x48] sm:$0xff]  ;;  %4197 = vmatpush3.bf16.msra.mxu1 %v4194_v29 }
 0x1d4   : > { %v5241_v40 = vpop.eup %4302  ;;  %v1732_v47 = vmul.f32 1.442695, %v1661_v43  ;;  %v1571_v5 = vpop.xlane.xlu1 %1570  ;;  %1884 = vadd.xlane.f32.xlu1 %v5239_v28  ;;  %4167 = vmatprep.subr.bf16.mxu0 %v4166_v6  ;;  %v4170_v43 = vpack.c.bf16 %v2303_v15, %v2302_v27 }
 0x1d5   : > { %v1676_v0 = vsub.f32 %v4997_v31, %v1571_v5  ;;  %1850 = vadd.xlane.f32.xlu0 %v5241_v40  ;;  %v1539_v22 = vpop.xlane.xlu0 %1538  ;;  %v5251_v60 = vpop.eup %4304  ;;  %4169 = vmatpush3.bf16.msra.mxu0 %v4166_v6  ;;  %v2318_v6 = vld [vmem:[%s5208_s7 + $0xc0] sm:$0xff] }
 0x1d6   : > { %4314 = vpow2.f32 %v1732_v47  ;;  %v1660_v62 = vsub.f32 %v5000_v35, %v1539_v22  ;;  %v2317_v47 = vld [vmem:[%s5208_s7 + $0xb8] sm:$0xff]  ;;  %4171 = vmatprep.subr.bf16.mxu0 %v4170_v43 }
 0x1d7   : > { %4316 = vpow2.f32 %v1764_v52  ;;  %v1762_v19 = vmul.f32 1.442695, %v1676_v0  ;;  %v4198_v9 = vpack.c.bf16 %v2317_v47, %v2316_v42  ;;  %v2304_v0 = vld [vmem:[%s5208_s7 + $0x50] sm:$0xff]  ;;  %v2305_v22 = vld [vmem:[%s5208_s7 + $0x58] sm:$0xff] }
 0x1d8   : > { %v5253_v25 = vpop.eup %4306  ;;  %v1730_v31 = vmul.f32 1.442695, %v1660_v62  ;;  %v1577_v13 = vpop.xlane.xlu1 %1576  ;;  %1882 = vadd.xlane.f32.xlu1 %v5251_v60  ;;  %v4174_v29 = vpack.c.bf16 %v2305_v22, %v2304_v0 }
 0x1d9   : > { %v1679_v3 = vsub.f32 %v5003_v37, %v1577_v13  ;;  %1856 = vadd.xlane.f32.xlu0 %v5253_v25  ;;  %v1545_v35 = vpop.xlane.xlu0 %1544  ;;  %v5263_v21 = vpop.eup %4308  ;;  %4199 = vmatprep.subr.bf16.mxu1 %v4198_v9 }
 0x1da   : > { %4318 = vpow2.f32 %v1730_v31  ;;  %v1663_v5 = vsub.f32 %v5005_v39, %v1545_v35  ;;  %4173 = vmatpush3.bf16.msra.mxu0 %v4170_v43  ;;  %v2319_v31 = vld [vmem:[%s5208_s7 + $0xc8] sm:$0xff]  ;;  %4201 = vmatpush3.bf16.msra.mxu1 %v4198_v9  ;;  %v2320_v43 = vld [vmem:[%s5208_s7 + $0xd0] sm:$0xff] }
 0x1db   : > { %4320 = vpow2.f32 %v1762_v19  ;;  %v1768_v53 = vmul.f32 1.442695, %v1679_v3  ;;  %v4202_v27 = vpack.c.bf16 %v2319_v31, %v2318_v6  ;;  %4175 = vmatprep.subr.bf16.mxu0 %v4174_v29  ;;  %v2306_v3 = vld [vmem:[%s5208_s7 + $0x60] sm:$0xff]  ;;  %v2307_v35 = vld [vmem:[%s5208_s7 + $0x68] sm:$0xff] }
 0x1dc   : > { %v5265_v51 = vpop.eup %4310  ;;  %v1736_v37 = vmul.f32 1.442695, %v1663_v5  ;;  %v1575_v52 = vpop.xlane.xlu1 %1574  ;;  %1888 = vadd.xlane.f32.xlu1 %v5263_v21  ;;  %v4178_v9 = vpack.c.bf16 %v2307_v35, %v2306_v3 }
 0x1dd   : > { %v1678_v39 = vsub.f32 %v5013_v44, %v1575_v52  ;;  %1854 = vadd.xlane.f32.xlu0 %v5265_v51  ;;  %v1543_v62 = vpop.xlane.xlu0 %1542  ;;  %v5275_v15 = vpop.eup %4312  ;;  %4203 = vmatprep.subr.bf16.mxu1 %v4202_v27 }
 0x1de   : > { %4322 = vpow2.f32 %v1736_v37  ;;  %v1662_v13 = vsub.f32 %v5016_v46, %v1543_v62  ;;  %4177 = vmatpush3.bf16.msra.mxu0 %v4174_v29  ;;  %v2321_v37 = vld [vmem:[%s5208_s7 + $0xd8] sm:$0xff]  ;;  %4205 = vmatpush3.bf16.msra.mxu1 %v4202_v27  ;;  %v2322_v29 = vld [vmem:[%s5208_s7 + $0xe0] sm:$0xff] }
 0x1df   : > { %4324 = vpow2.f32 %v1768_v53  ;;  %v1766_v47 = vmul.f32 1.442695, %v1678_v39  ;;  %v4206_v0 = vpack.c.bf16 %v2321_v37, %v2320_v43  ;;  %4179 = vmatprep.subr.bf16.mxu0 %v4178_v9  ;;  %v2308_v39 = vld [vmem:[%s5208_s7 + $0x70] sm:$0xff]  ;;  %v2309_v62 = vld [vmem:[%s5208_s7 + $0x78] sm:$0xff] }
 0x1e0   : > { %v5277_v42 = vpop.eup %4314  ;;  %v1734_v44 = vmul.f32 1.442695, %v1662_v13  ;;  %v1581_v19 = vpop.xlane.xlu1 %1580  ;;  %1886 = vadd.xlane.f32.xlu1 %v5275_v15  ;;  %v4182_v27 = vpack.c.bf16 %v2309_v62, %v2308_v39 }
 0x1e1   : > { %v1681_v46 = vsub.f32 %v5019_v48, %v1581_v19  ;;  %1860 = vadd.xlane.f32.xlu0 %v5277_v42  ;;  %v1549_v5 = vpop.xlane.xlu0 %1548  ;;  %v5287_v22 = vpop.eup %4316  ;;  %4207 = vmatprep.subr.bf16.mxu1 %v4206_v0 }
 0x1e2   : > { %4326 = vpow2.f32 %v1734_v44  ;;  %v1665_v52 = vsub.f32 %v5021_v49, %v1549_v5  ;;  %4181 = vmatpush3.bf16.msra.mxu0 %v4178_v9  ;;  %v2323_v44 = vld [vmem:[%s5208_s7 + $0xe8] sm:$0xff]  ;;  %4209 = vmatpush3.bf16.msra.mxu1 %v4206_v0  ;;  %v2325_v5 = vld [vmem:[%s5208_s7 + $0xf8] sm:$0xff] }
 0x1e3   : > { %4328 = vpow2.f32 %v1766_v47  ;;  %v1772_v31 = vmul.f32 1.442695, %v1681_v46  ;;  %v4210_v3 = vpack.c.bf16 %v2323_v44, %v2322_v29  ;;  %4183 = vmatprep.subr.bf16.mxu0 %v4182_v27  ;;  %v2324_v46 = vld [vmem:[%s5208_s7 + $0xf0] sm:$0xff] }
 0x1e4   : > { %v5289_v6 = vpop.eup %4318  ;;  %v1740_v48 = vmul.f32 1.442695, %v1665_v52  ;;  %v1579_v53 = vpop.xlane.xlu1 %1578  ;;  %1892 = vadd.xlane.f32.xlu1 %v5287_v22  ;;  %v4214_v52 = vpack.c.bf16 %v2325_v5, %v2324_v46 }
 0x1e5   : > { %v1680_v49 = vsub.f32 %v5029_v55, %v1579_v53  ;;  %1858 = vadd.xlane.f32.xlu0 %v5289_v6  ;;  %v1547_v13 = vpop.xlane.xlu0 %1546  ;;  %v5299_v35 = vpop.eup %4320  ;;  %4211 = vmatprep.subr.bf16.mxu1 %v4210_v3 }
 0x1e6   : > { %4330 = vpow2.f32 %v1740_v48  ;;  %v1664_v19 = vsub.f32 %v5032_v57, %v1547_v13  ;;  %4185 = vmatpush3.bf16.msra.mxu0 %v4182_v27  ;;  %4213 = vmatpush3.bf16.msra.mxu1 %v4210_v3 }
 0x1e7   : > { %4332 = vpow2.f32 %v1772_v31  ;;  %v1770_v9 = vmul.f32 1.442695, %v1680_v49  ;;  %4215 = vmatprep.subr.bf16.mxu1 %v4214_v52 }
 0x1e8   : > { %v5301_v43 = vpop.eup %4322  ;;  %v1738_v47 = vmul.f32 1.442695, %v1664_v19  ;;  %v1585_v55 = vpop.xlane.xlu1 %1584  ;;  %1890 = vadd.xlane.f32.xlu1 %v5299_v35 }
 0x1e9   : > { %v1683_v37 = vsub.f32 %v5035_v58, %v1585_v55  ;;  %1864 = vadd.xlane.f32.xlu0 %v5301_v43  ;;  %v1553_v57 = vpop.xlane.xlu0 %1552  ;;  %v5309_v48 = vpop.eup %4324 }
 0x1ea   : > { %4334 = vpow2.f32 %v1738_v47  ;;  %v1667_v0 = vsub.f32 %v5037_v59, %v1553_v57  ;;  %4217 = vmatpush3.bf16.msra.mxu1 %v4214_v52 }
 0x1eb   : > { %4336 = vpow2.f32 %v1770_v9  ;;  %v1776_v58 = vmul.f32 1.442695, %v1683_v37 }
 0x1ec   : > { %v5311_v53 = vpop.eup %4326  ;;  %v1744_v39 = vmul.f32 1.442695, %v1667_v0  ;;  %v1583_v62 = vpop.xlane.xlu1 %1582  ;;  %1896 = vadd.xlane.f32.xlu1 %v5309_v48 }
 0x1ed   : > { %v1682_v29 = vsub.f32 %v5045_v1, %v1583_v62  ;;  %1862 = vadd.xlane.f32.xlu0 %v5311_v53  ;;  %v1551_v31 = vpop.xlane.xlu0 %1550  ;;  %v5317_v49 = vpop.eup %4328 }
 0x1ee   : > { %4338 = vpow2.f32 %v1744_v39  ;;  %v1666_v59 = vsub.f32 %v5048_v4, %v1551_v31 }
 0x1ef   : > { %4340 = vpow2.f32 %v1776_v58  ;;  %v1774_v19 = vmul.f32 1.442695, %v1682_v29 }
 0x1f0   : > { %v5319_v13 = vpop.eup %4330  ;;  %v1742_v27 = vmul.f32 1.442695, %v1666_v59  ;;  %v1589_v44 = vpop.xlane.xlu1 %1588  ;;  %1894 = vadd.xlane.f32.xlu1 %v5317_v49 }
 0x1f1   : > { %v1685_v3 = vsub.f32 %v5051_v7, %v1589_v44  ;;  %1868 = vadd.xlane.f32.xlu0 %v5319_v13  ;;  %v1557_v1 = vpop.xlane.xlu0 %1556  ;;  %v5325_v4 = vpop.eup %4332 }
 0x1f2   : > { %4342 = vpow2.f32 %v1742_v27  ;;  %v1669_v47 = vsub.f32 %v5053_v8, %v1557_v1 }
 0x1f3   : > { %4344 = vpow2.f32 %v1774_v19  ;;  %v1780_v9 = vmul.f32 1.442695, %v1685_v3 }
 0x1f4   : > { %v5327_v55 = vpop.eup %4334  ;;  %v1748_v46 = vmul.f32 1.442695, %v1669_v47  ;;  %v1587_v5 = vpop.xlane.xlu1 %1586  ;;  %1900 = vadd.xlane.f32.xlu1 %v5325_v4 }
 0x1f5   : > { %v1684_v37 = vsub.f32 %v5060_v11, %v1587_v5  ;;  %1866 = vadd.xlane.f32.xlu0 %v5327_v55  ;;  %v1555_v7 = vpop.xlane.xlu0 %1554  ;;  %v5333_v52 = vpop.eup %4336 }
 0x1f6   : > { %4346 = vpow2.f32 %v1748_v46  ;;  %v1668_v57 = vsub.f32 %v5062_v12, %v1555_v7 }
 0x1f7   : > { %4348 = vpow2.f32 %v1780_v9  ;;  %v1778_v39 = vmul.f32 1.442695, %v1684_v37  ;;  %v5857_v37 = vld [vmem:[#allocation3_spill] sm:$0xff] }
 0x1f8   : > { %v5335_v8 = vpop.eup %4338  ;;  %v1746_v0 = vmul.f32 1.442695, %v1668_v57  ;;  %1898 = vadd.xlane.f32.xlu1 %v5333_v52  ;;  %v5858_v57 = vld [vmem:[#allocation2_spill] sm:$0xff] }
 0x1f9   : > { %v1625_v62 = vpop.xlane.xlu1 %1624  ;;  %1872 = vadd.xlane.f32.xlu0 %v5335_v8  ;;  %v1593_v58 = vpop.xlane.xlu0 %1592 }
 0x1fa   : > { %4350 = vpow2.f32 %v1746_v0  ;;  %v1703_v11 = vsub.f32 %v5070_v23, %v1625_v62  ;;  %v1687_v29 = vsub.f32 %v5068_v17, %v1593_v58  ;;  %v5341_v31 = vpop.eup %4340 }
 0x1fb   : > { %4352 = vpow2.f32 %v1778_v39 }
 0x1fc   : > { %v5343_v12 = vpop.eup %4342  ;;  %v1784_v59 = vmul.f32 1.442695, %v1687_v29  ;;  %1904 = vadd.xlane.f32.xlu1 %v5341_v31  ;;  %v1816_v27 = vmul.f32 1.442695, %v1703_v11  ;;  %v5859_v29 = vld [vmem:[#allocation5_spill] sm:$0xff] }
 0x1fd   : > { %v1623_v44 = vpop.xlane.xlu1 %1622  ;;  %1870 = vadd.xlane.f32.xlu0 %v5343_v12  ;;  %v1591_v19 = vpop.xlane.xlu0 %1590 }
 0x1fe   : > { %v1702_v3 = vsub.f32 %v5080_v34, %v1623_v44  ;;  %v1686_v1 = vsub.f32 %v5078_v33, %v1591_v19  ;;  %v5349_v23 = vpop.eup %4344  ;;  %4354 = vpow2.f32 %v1784_v59 }
 0x1ff   : > { %4356 = vpow2.f32 %v1816_v27  ;;  %v5860_v27 = vld [vmem:[#allocation4_spill] sm:$0xff] }
 0x200   : > { %v5351_v17 = vpop.eup %4346  ;;  %v1782_v47 = vmul.f32 1.442695, %v1686_v1  ;;  %1902 = vadd.xlane.f32.xlu1 %v5349_v23  ;;  %v1814_v46 = vmul.f32 1.442695, %v1702_v3 }
 0x201   : > { %v1629_v5 = vpop.xlane.xlu1 %1628  ;;  %1876 = vadd.xlane.f32.xlu0 %v5351_v17  ;;  %v1597_v9 = vpop.xlane.xlu0 %1596 }
 0x202   : > { %v1705_v7 = vsub.f32 %v5857_v37, %v1629_v5  ;;  %v1689_v34 = vsub.f32 %v5858_v57, %v1597_v9  ;;  %v5357_v0 = vpop.eup %4348  ;;  %4358 = vpow2.f32 %v1782_v47  ;;  %v2326_v9 = vld [vmem:[%s5208_s7 + $0x100] sm:$0xff]  ;;  %v2327_v37 = vld [vmem:[%s5208_s7 + $0x108] sm:$0xff] }
 0x203   : > { %4360 = vpow2.f32 %v1814_v46 }
 0x204   : > { %v5359_v33 = vpop.eup %4350  ;;  %v1788_v39 = vmul.f32 1.442695, %v1689_v34  ;;  %1908 = vadd.xlane.f32.xlu1 %v5357_v0  ;;  %v1820_v62 = vmul.f32 1.442695, %v1705_v7  ;;  %v5862_v7 = vld [vmem:[#allocation7_spill] sm:$0xff]  ;;  %v5863_v34 = vld [vmem:[#allocation6_spill] sm:$0xff] }
 0x205   : > { %v1627_v58 = vpop.xlane.xlu1 %1626  ;;  %1874 = vadd.xlane.f32.xlu0 %v5359_v33  ;;  %v1595_v11 = vpop.xlane.xlu0 %1594 }
 0x206   : > { %v1704_v59 = vsub.f32 %v5859_v29, %v1627_v58  ;;  %v1688_v44 = vsub.f32 %v5860_v27, %v1595_v11  ;;  %v5365_v19 = vpop.eup %4352  ;;  %4362 = vpow2.f32 %v1788_v39  ;;  %v5375_v39 = vpack.c.bf16 %v2327_v37, %v2326_v9 }
 0x207   : > { %4364 = vpow2.f32 %v1820_v62  ;;  %v2342_v62 = vld [vmem:[%s5208_s7 + $0x180] sm:$0xff] }
 0x208   : > { %v1786_v3 = vmul.f32 1.442695, %v1688_v44  ;;  %1906 = vadd.xlane.f32.xlu1 %v5365_v19  ;;  %v5368_v1 = vpop.eup %4354  ;;  %v1818_v47 = vmul.f32 1.442695, %v1704_v59  ;;  %4219 = vmatprep.subr.bf16.mxu0 %v5375_v39  ;;  %v2343_v59 = vld [vmem:[%s5208_s7 + $0x188] sm:$0xff] }
 0x209   : > { %5861 = vst [vmem:[#allocation3_spill] sm:$0xff] %v5368_v1  ;;  %v1633_v46 = vpop.xlane.xlu1 %1632  ;;  %v1601_v5 = vpop.xlane.xlu0 %1600  ;;  %1912 = vadd.xlane.f32.xlu0 %v5368_v1  ;;  %v5385_v1 = vpack.c.bf16 %v2343_v59, %v2342_v62 }
 0x20a   : > { %v1707_v57 = vsub.f32 %v5862_v7, %v1633_v46  ;;  %v1691_v58 = vsub.f32 %v5863_v34, %v1601_v5  ;;  %v5377_v11 = vpop.eup %4356  ;;  %4366 = vpow2.f32 %v1786_v3  ;;  %v5866_v5 = vld [vmem:[#allocation9_spill] sm:$0xff]  ;;  %v5867_v3 = vld [vmem:[#allocation8_spill] sm:$0xff] }
 0x20b   : > { %5864 = vst [vmem:[#allocation2_spill] sm:$0xff] %v5377_v11  ;;  %4368 = vpow2.f32 %v1818_v47  ;;  %4251 = vmatprep.subr.bf16.mxu1 %v5385_v1 }
 0x20c   : > { %v1792_v29 = vmul.f32 1.442695, %v1691_v58  ;;  %1944 = vadd.xlane.f32.xlu1 %v5377_v11  ;;  %v5383_v27 = vpop.eup %4358  ;;  %v1824_v44 = vmul.f32 1.442695, %v1707_v57  ;;  %v5869_v11 = vld [vmem:[#allocation11_spill] sm:$0xff] }
 0x20d   : > { %5865 = vst [vmem:[#allocation5_spill] sm:$0xff] %v5383_v27  ;;  %v1631_v46 = vpop.xlane.xlu1 %1630  ;;  %v1599_v7 = vpop.xlane.xlu0 %1598  ;;  %1910 = vadd.xlane.f32.xlu0 %v5383_v27 }
 0x20e   : > { %v1706_v9 = vsub.f32 %v5866_v5, %v1631_v46  ;;  %v1690_v37 = vsub.f32 %v5867_v3, %v1599_v7  ;;  %v5390_v34 = vpop.eup %4360  ;;  %4370 = vpow2.f32 %v1792_v29  ;;  %v5870_v5 = vld [vmem:[#allocation10_spill] sm:$0xff] }
 0x20f   : > { %5868 = vst [vmem:[#allocation4_spill] sm:$0xff] %v5390_v34  ;;  %4372 = vpow2.f32 %v1824_v44 }
 0x210   : > { %v1790_v58 = vmul.f32 1.442695, %v1690_v37  ;;  %1942 = vadd.xlane.f32.xlu1 %v5390_v34  ;;  %v5394_v47 = vpop.eup %4362  ;;  %v1822_v57 = vmul.f32 1.442695, %v1706_v9 }
 0x211   : > { %v1637_v62 = vpop.xlane.xlu1 %1636  ;;  %v1605_v59 = vpop.xlane.xlu0 %1604  ;;  %1916 = vadd.xlane.f32.xlu0 %v5394_v47 }
 0x212   : > { %v1709_v46 = vsub.f32 %v5869_v11, %v1637_v62  ;;  %v1693_v7 = vsub.f32 %v5870_v5, %v1605_v59  ;;  %v5399_v3 = vpop.eup %4364  ;;  %4374 = vpow2.f32 %v1790_v58 }
 0x213   : > { %4376 = vpow2.f32 %v1822_v57 }
 0x214   : > { %v1796_v29 = vmul.f32 1.442695, %v1693_v7  ;;  %1948 = vadd.xlane.f32.xlu1 %v5399_v3  ;;  %v5402_v37 = vpop.eup %4366  ;;  %v1828_v34 = vmul.f32 1.442695, %v1709_v46 }
 0x215   : > { %v1635_v44 = vpop.xlane.xlu1 %1634  ;;  %v1603_v9 = vpop.xlane.xlu0 %1602  ;;  %1914 = vadd.xlane.f32.xlu0 %v5402_v37 }
 0x216   : > { %v1708_v27 = vsub.f32 %v5128_v32, %v1635_v44  ;;  %v1692_v11 = vsub.f32 %v5126_v30, %v1603_v9  ;;  %v5407_v62 = vpop.eup %4368  ;;  %4378 = vpow2.f32 %v1796_v29 }
 0x217   : > { %4380 = vpow2.f32 %v1828_v34 }
 0x218   : > { %v1794_v59 = vmul.f32 1.442695, %v1692_v11  ;;  %1946 = vadd.xlane.f32.xlu1 %v5407_v62  ;;  %v5410_v58 = vpop.eup %4370  ;;  %v1826_v5 = vmul.f32 1.442695, %v1708_v27 }
 0x219   : > { %v1641_v57 = vpop.xlane.xlu1 %1640  ;;  %v1609_v46 = vpop.xlane.xlu0 %1608  ;;  %1920 = vadd.xlane.f32.xlu0 %v5410_v58 }
 0x21a   : > { %v1711_v7 = vsub.f32 %v5133_v63, %v1641_v57  ;;  %v1695_v32 = vsub.f32 %v5131_v54, %v1609_v46  ;;  %v5415_v44 = vpop.eup %4372  ;;  %4382 = vpow2.f32 %v1794_v59 }
 0x21b   : > { %4384 = vpow2.f32 %v1826_v5 }
 0x21c   : > { %v1800_v30 = vmul.f32 1.442695, %v1695_v32  ;;  %1952 = vadd.xlane.f32.xlu1 %v5415_v44  ;;  %v5418_v29 = vpop.eup %4374  ;;  %v1832_v9 = vmul.f32 1.442695, %v1711_v7 }
 0x21d   : > { %v1639_v34 = vpop.xlane.xlu1 %1638  ;;  %v1607_v27 = vpop.xlane.xlu0 %1606  ;;  %1918 = vadd.xlane.f32.xlu0 %v5418_v29 }
 0x21e   : > { %v1710_v11 = vsub.f32 %v5144_v50, %v1639_v34  ;;  %v1694_v63 = vsub.f32 %v5142_v14, %v1607_v27  ;;  %v5423_v57 = vpop.eup %4376  ;;  %4386 = vpow2.f32 %v1800_v30 }
 0x21f   : > { %4388 = vpow2.f32 %v1832_v9 }
 0x220   : > { %v1798_v54 = vmul.f32 1.442695, %v1694_v63  ;;  %1950 = vadd.xlane.f32.xlu1 %v5423_v57  ;;  %v5426_v59 = vpop.eup %4378  ;;  %v1830_v46 = vmul.f32 1.442695, %v1710_v11 }
 0x221   : > { %v1645_v5 = vpop.xlane.xlu1 %1644  ;;  %v1613_v7 = vpop.xlane.xlu0 %1612  ;;  %1924 = vadd.xlane.f32.xlu0 %v5426_v59 }
 0x222   : > { %v1713_v32 = vsub.f32 %v5149_v24, %v1645_v5  ;;  %v1697_v50 = vsub.f32 %v5147_v20, %v1613_v7  ;;  %v5431_v34 = vpop.eup %4380  ;;  %4390 = vpow2.f32 %v1798_v54 }
 0x223   : > { %5871 = vst [vmem:[#allocation7_spill] sm:$0xff] %v5431_v34  ;;  %4392 = vpow2.f32 %v1830_v46 }
 0x224   : > { %v1804_v14 = vmul.f32 1.442695, %v1697_v50  ;;  %1956 = vadd.xlane.f32.xlu1 %v5431_v34  ;;  %v5434_v30 = vpop.eup %4382  ;;  %v1836_v27 = vmul.f32 1.442695, %v1713_v32 }
 0x225   : > { %v1643_v9 = vpop.xlane.xlu1 %1642  ;;  %v1611_v11 = vpop.xlane.xlu0 %1610  ;;  %1922 = vadd.xlane.f32.xlu0 %v5434_v30 }
 0x226   : > { %v1712_v63 = vsub.f32 %v5160_v61, %v1643_v9  ;;  %v1696_v24 = vsub.f32 %v5158_v26, %v1611_v11  ;;  %v5439_v5 = vpop.eup %4384  ;;  %4394 = vpow2.f32 %v1804_v14  ;;  %v5874_v61 = vld [vmem:[#allocation12_spill] sm:$0xff] }
 0x227   : > { %5872 = vst [vmem:[#allocation6_spill] sm:$0xff] %v5439_v5  ;;  %4396 = vpow2.f32 %v1836_v27 }
 0x228   : > { %v1802_v20 = vmul.f32 1.442695, %v1696_v24  ;;  %1954 = vadd.xlane.f32.xlu1 %v5439_v5  ;;  %v5442_v54 = vpop.eup %4386  ;;  %v1834_v7 = vmul.f32 1.442695, %v1712_v63  ;;  %v2330_v5 = vld [vmem:[%s5208_s7 + $0x120] sm:$0xff] }
 0x229   : > { %5873 = vst [vmem:[#allocation9_spill] sm:$0xff] %v5442_v54  ;;  %v1649_v46 = vpop.xlane.xlu1 %1648  ;;  %v1617_v32 = vpop.xlane.xlu0 %1616  ;;  %1928 = vadd.xlane.f32.xlu0 %v5442_v54  ;;  %v2345_v54 = vld [vmem:[%s5208_s7 + $0x198] sm:$0xff] }
 0x22a   : > { %v1715_v50 = vsub.f32 %v5165_v36, %v1649_v46  ;;  %v1699_v9 = vsub.f32 %v5874_v61, %v1617_v32  ;;  %v5447_v34 = vpop.eup %4388  ;;  %4398 = vpow2.f32 %v1802_v20 }
 0x22b   : > { %5875 = vst [vmem:[#allocation8_spill] sm:$0xff] %v5447_v34  ;;  %4400 = vpow2.f32 %v1834_v7 }
 0x22c   : > { %v1808_v26 = vmul.f32 1.442695, %v1699_v9  ;;  %1960 = vadd.xlane.f32.xlu1 %v5447_v34  ;;  %v5450_v14 = vpop.eup %4390  ;;  %v1840_v11 = vmul.f32 1.442695, %v1715_v50 }
 0x22d   : > { %5876 = vst [vmem:[#allocation11_spill] sm:$0xff] %v5450_v14  ;;  %v1647_v27 = vpop.xlane.xlu1 %1646  ;;  %v1615_v63 = vpop.xlane.xlu0 %1614  ;;  %1926 = vadd.xlane.f32.xlu0 %v5450_v14  ;;  %v2344_v14 = vld [vmem:[%s5208_s7 + $0x190] sm:$0xff] }
 0x22e   : > { %v1714_v24 = vsub.f32 %v5176_v2, %v1647_v27  ;;  %v1698_v36 = vsub.f32 %v5174_v56, %v1615_v63  ;;  %v5455_v46 = vpop.eup %4392  ;;  %4402 = vpow2.f32 %v1808_v26 }
 0x22f   : > { %5877 = vst [vmem:[#allocation10_spill] sm:$0xff] %v5455_v46  ;;  %4404 = vpow2.f32 %v1840_v11  ;;  %v5881_v11 = vld [vmem:[#allocation14_spill] sm:$0xff] }
 0x230   : > { %v1806_v32 = vmul.f32 1.442695, %v1698_v36  ;;  %1958 = vadd.xlane.f32.xlu1 %v5455_v46  ;;  %v5458_v20 = vpop.eup %4394  ;;  %v1838_v61 = vmul.f32 1.442695, %v1714_v24 }
 0x231   : > { %5878 = vst [vmem:[#allocation12_spill] sm:$0xff] %v5458_v20  ;;  %v1653_v7 = vpop.xlane.xlu1 %1652  ;;  %v1621_v50 = vpop.xlane.xlu0 %1620  ;;  %1932 = vadd.xlane.f32.xlu0 %v5458_v20  ;;  %v5883_v20 = vld [vmem:[#allocation13_spill] sm:$0xff] }
 0x232   : > { %v5461_v9 = vpop.eup %4396  ;;  %4406 = vpow2.f32 %v1806_v32  ;;  %v1717_v27 = vsub.f32 %v5181_v18, %v1653_v7  ;;  %v1701_v46 = vsub.f32 %v5883_v20, %v1621_v50 }
 0x233   : > { %5879 = vst [vmem:[#allocation16_spill] sm:$0xff] %v5461_v9  ;;  %4408 = vpow2.f32 %v1838_v61 }
 0x234   : > { %1964 = vadd.xlane.f32.xlu1 %v5461_v9  ;;  %v5464_v56 = vpop.eup %4398  ;;  %v1844_v61 = vmul.f32 1.442695, %v1717_v27 }
 0x235   : > { %5880 = vst [vmem:[#allocation17_spill] sm:$0xff] %v5464_v56  ;;  %v1651_v2 = vpop.xlane.xlu1 %1650  ;;  %v1619_v26 = vpop.xlane.xlu0 %1618  ;;  %1930 = vadd.xlane.f32.xlu0 %v5464_v56 }
 0x236   : > { %v1716_v63 = vsub.f32 %v5190_v10, %v1651_v2  ;;  %v1700_v24 = vsub.f32 %v5881_v11, %v1619_v26  ;;  %v5470_v36 = vpop.eup %4400  ;;  %v1812_v10 = vmul.f32 1.442695, %v1701_v46 }
 0x237   : > { %5882 = vst [vmem:[#allocation14_spill] sm:$0xff] %v5470_v36 }
 0x238   : > { %v1842_v32 = vmul.f32 1.442695, %v1716_v63  ;;  %v1810_v34 = vmul.f32 1.442695, %v1700_v24  ;;  %1962 = vadd.xlane.f32.xlu1 %v5470_v36  ;;  %v5474_v9 = vpop.eup %4402  ;;  %v2183_v36 = vld [vmem:[%s5502_s10 + $0x88] sm:$0xff] }
 0x239   : > { %5884 = vst [vmem:[#allocation13_spill] sm:$0xff] %v5474_v9  ;;  %1936 = vadd.xlane.f32.xlu0 %v5474_v9  ;;  %v5477_v18 = vpop.eup %4404 }
 0x23a   : > { %4410 = vpow2.f32 %v1842_v32  ;;  %5885 = vst [vmem:[#allocation18_spill] sm:$0xff] %v5477_v18 }
 0x23b   : > { %4412 = vpow2.f32 %v1810_v34 }
 0x23c   : > { %1968 = vadd.xlane.f32.xlu1 %v5477_v18  ;;  %v5480_v7 = vpop.eup %4406  ;;  %4414 = vpow2.f32 %v1844_v61 }
 0x23d   : > { %5886 = vst [vmem:[#allocation19_spill] sm:$0xff] %v5480_v7  ;;  %1934 = vadd.xlane.f32.xlu0 %v5480_v7  ;;  %v5483_v20 = vpop.eup %4408  ;;  %4416 = vpow2.f32 %v1812_v10 }
 0x23e   : > { %5887 = vst [vmem:[#allocation20_spill] sm:$0xff] %v5483_v20 }
 0x240   : > { %1966 = vadd.xlane.f32.xlu1 %v5483_v20  ;;  %v5892_v20 = vld [vmem:[#allocation15_spill] sm:$0xff] }
 0x244   : > { %v5486_v50 = vpop.eup %4410 }
 0x245   : > { %5888 = vst [vmem:[#allocation21_spill] sm:$0xff] %v5486_v50  ;;  %v5488_v2 = vpop.eup %4412  ;;  %1970 = vadd.xlane.f32.xlu1 %v5486_v50 }
 0x246   : > { %5889 = vst [vmem:[#allocation22_spill] sm:$0xff] %v5488_v2  ;;  %1938 = vadd.xlane.f32.xlu0 %v5488_v2  ;;  %v5492_v34 = vpop.eup %4414  ;;  %v2329_v2 = vld [vmem:[%s5208_s7 + $0x118] sm:$0xff] }
 0x247   : > { %5890 = vst [vmem:[#allocation23_spill] sm:$0xff] %v5492_v34  ;;  %v5494_v46 = vpop.eup %4416 }
 0x248   : > { %5891 = vst [vmem:[#allocation24_spill] sm:$0xff] %v5494_v46 }
 0x249   : > { %1972 = vadd.xlane.f32.xlu1 %v5492_v34  ;;  %v2328_v34 = vld [vmem:[%s5208_s7 + $0x110] sm:$0xff] }
 0x24a   : > { %1940 = vadd.xlane.f32.xlu0 %v5494_v46  ;;  %v2167_v46 = vld [vmem:[%s5502_s10 + $0x8] sm:$0xff]  ;;  %v4222_v56 = vpack.c.bf16 %v2329_v2, %v2328_v34 }
 0x255   : > { %v1849_v26 = vpop.xlane.xlu0 %1848 }
 0x256   : > { %4418 = vrcp.f32 %v1849_v26 }
 0x259   : > { %v1881_v27 = vpop.xlane.xlu1 %1880  ;;  %v1847_v63 = vpop.xlane.xlu0 %1846 }
 0x25a   : > { %4420 = vrcp.f32 %v1881_v27 }
 0x25b   : > { %4422 = vrcp.f32 %v1847_v63 }
 0x25d   : > { %v1879_v11 = vpop.xlane.xlu1 %1878 }
 0x25e   : > { %4424 = vrcp.f32 %v1879_v11  ;;  %v1853_v24 = vpop.xlane.xlu0 %1852 }
 0x25f   : > { %4426 = vrcp.f32 %v1853_v24  ;;  %v2166_v24 = vld [vmem:[%s5502_s10] sm:$0xff] }
 0x260   : > { %v4419_v61 = vpop.eup %4418 }
 0x261   : > { %v1885_v32 = vpop.xlane.xlu1 %1884  ;;  %v2103_v63 = vmul.f32 %v4419_v61, %v5202_v16  ;;  %v2182_v16 = vld [vmem:[%s5502_s10 + $0x80] sm:$0xff] }
 0x262   : > { %4428 = vrcp.f32 %v1885_v32  ;;  %v1851_v10 = vpop.xlane.xlu0 %1850 }
 0x263   : > { %4430 = vrcp.f32 %v1851_v10  ;;  %v2231_v9 = vmul.f32 %v2167_v46, %v2103_v63 }
 0x264   : > { %v4421_v26 = vpop.eup %4420 }
 0x265   : > { %v4423_v27 = vpop.eup %4422  ;;  %v1883_v11 = vpop.xlane.xlu1 %1882  ;;  %v2119_v18 = vmul.f32 %v4421_v26, %v5892_v20  ;;  %v2331_v20 = vld [vmem:[%s5208_s7 + $0x128] sm:$0xff] }
 0x266   : > { %4432 = vrcp.f32 %v1883_v11  ;;  %v1857_v32 = vpop.xlane.xlu0 %1856  ;;  %v2102_v10 = vmul.f32 %v4423_v27, %v5214_v45  ;;  %v4226_v63 = vpack.c.bf16 %v2331_v20, %v2330_v5 }
 0x267   : > { %4434 = vrcp.f32 %v1857_v32  ;;  %v2247_v46 = vmul.f32 %v2183_v36, %v2119_v18  ;;  %v2347_v32 = vld [vmem:[%s5208_s7 + $0x1a8] sm:$0xff] }
 0x268   : > { %v4425_v50 = vpop.eup %4424  ;;  %v2230_v7 = vmul.f32 %v2166_v24, %v2102_v10 }
 0x269   : > { %v1889_v61 = vpop.xlane.xlu1 %1888  ;;  %v2118_v11 = vmul.f32 %v4425_v50, %v5231_v38  ;;  %v4427_v45 = vpop.eup %4426  ;;  %v4254_v38 = vpack.c.bf16 %v2345_v54, %v2344_v14  ;;  %v2332_v54 = vld [vmem:[%s5208_s7 + $0x130] sm:$0xff]  ;;  %v2333_v14 = vld [vmem:[%s5208_s7 + $0x138] sm:$0xff] }
 0x26a   : > { %4436 = vrcp.f32 %v1889_v61  ;;  %3770 = vmatprep.mubr.f32.mxu0 %v2230_v7  ;;  %v1855_v27 = vpop.xlane.xlu0 %1854  ;;  %v2168_v7 = vld [vmem:[%s5502_s10 + $0x10] sm:$0xff]  ;;  %v2105_v34 = vmul.f32 %v4427_v45, %v5233_v41  ;;  %v4230_v20 = vpack.c.bf16 %v2333_v14, %v2332_v54  ;;  %v2351_v54 = vld [vmem:[%s5208_s7 + $0x1c8] sm:$0xff] }
 0x26b   : > { %3771 = vmatmul.mubr.f32.vlgmr.msra.gmra.mrb[32].mxu0 %v2231_v9  ;;  %4438 = vrcp.f32 %v1855_v27  ;;  %v2246_v26 = vmul.f32 %v2182_v16, %v2118_v11  ;;  %v2346_v9 = vld [vmem:[%s5208_s7 + $0x1a0] sm:$0xff]  ;;  %v2184_v16 = vld [vmem:[%s5502_s10 + $0x90] sm:$0xff]  ;;  %v2185_v27 = vld [vmem:[%s5502_s10 + $0x98] sm:$0xff] }
 0x26c   : > { %v4429_v24 = vpop.eup %4428  ;;  %4221 = vmatpush3.bf16.msra.mxu0 %v5375_v39  ;;  %v2169_v39 = vld [vmem:[%s5502_s10 + $0x18] sm:$0xff]  ;;  %v4258_v61 = vpack.c.bf16 %v2347_v32, %v2346_v9  ;;  %v2170_v32 = vld [vmem:[%s5502_s10 + $0x20] sm:$0xff]  ;;  %v2171_v14 = vld [vmem:[%s5502_s10 + $0x28] sm:$0xff] }
 0x26d   : > { %v4431_v50 = vpop.eup %4430  ;;  %3826 = vmatprep.mubr.f32.mxu1 %v2246_v26  ;;  %v1887_v2 = vpop.xlane.xlu1 %1886  ;;  %4223 = vmatprep.subr.bf16.mxu0 %v4222_v56  ;;  %v2121_v5 = vmul.f32 %v4429_v24, %v5239_v28  ;;  %v2233_v11 = vmul.f32 %v2169_v39, %v2105_v34  ;;  %v2349_v26 = vld [vmem:[%s5208_s7 + $0x1b8] sm:$0xff]  ;;  %v2334_v28 = vld [vmem:[%s5208_s7 + $0x140] sm:$0xff]  ;;  %v2335_v24 = vld [vmem:[%s5208_s7 + $0x148] sm:$0xff] }
 0x26e   : > { %4440 = vrcp.f32 %v1887_v2  ;;  %3827 = vmatmul.mubr.f32.vlgmr.msra.gmra.mrb[32].mxu1 %v2247_v46  ;;  %v1861_v36 = vpop.xlane.xlu0 %1860  ;;  %v2104_v18 = vmul.f32 %v4431_v50, %v5241_v40  ;;  %v2350_v39 = vld [vmem:[%s5208_s7 + $0x1c0] sm:$0xff] }
 0x26f   : > { %4253 = vmatpush3.bf16.msra.mxu1 %v5385_v1  ;;  %4442 = vrcp.f32 %v1861_v36  ;;  %v2348_v1 = vld [vmem:[%s5208_s7 + $0x1b0] sm:$0xff] }
 0x270   : > { %v4433_v10 = vpop.eup %4432  ;;  %v2232_v41 = vmul.f32 %v2168_v7, %v2104_v18  ;;  %4225 = vmatpush3.bf16.msra.mxu0 %v4222_v56  ;;  %4255 = vmatprep.subr.bf16.mxu1 %v4254_v38  ;;  %v4262_v7 = vpack.c.bf16 %v2349_v26, %v2348_v1  ;;  %v4234_v18 = vpack.c.bf16 %v2335_v24, %v2334_v28  ;;  %v2187_v1 = vld [vmem:[%s5502_s10 + $0xa8] sm:$0xff] }
 0x271   : > { %v1893_v40 = vpop.xlane.xlu1 %1892  ;;  %v2120_v45 = vmul.f32 %v4433_v10, %v5251_v60  ;;  %4227 = vmatprep.subr.bf16.mxu0 %v4226_v63  ;;  %v4435_v46 = vpop.eup %4434  ;;  %v2249_v60 = vmul.f32 %v2185_v27, %v2121_v5  ;;  %v2336_v10 = vld [vmem:[%s5208_s7 + $0x150] sm:$0xff]  ;;  %v2186_v5 = vld [vmem:[%s5502_s10 + $0xa0] sm:$0xff]  ;;  %v2339_v24 = vld [vmem:[%s5208_s7 + $0x168] sm:$0xff] }
 0x272   : > { %4444 = vrcp.f32 %v1893_v40  ;;  %3773 = vmatprep.mubr.f32.mxu0 %v2232_v41  ;;  %v1859_v50 = vpop.xlane.xlu0 %1858  ;;  %v2107_v36 = vmul.f32 %v4435_v46, %v5253_v25  ;;  %v2337_v41 = vld [vmem:[%s5208_s7 + $0x158] sm:$0xff] }
 0x273   : > { %4446 = vrcp.f32 %v1859_v50  ;;  %3774 = vmatmul.mubr.f32.gmra.mrb[34].mxu0 %v2233_v11  ;;  %v2248_v56 = vmul.f32 %v2184_v16, %v2120_v45  ;;  %4257 = vmatpush3.bf16.msra.mxu1 %v4254_v38  ;;  %v4266_v11 = vpack.c.bf16 %v2351_v54, %v2350_v39  ;;  %v4238_v26 = vpack.c.bf16 %v2337_v41, %v2336_v10  ;;  %v2353_v46 = vld [vmem:[%s5208_s7 + $0x1d8] sm:$0xff]  ;;  %v2354_v39 = vld [vmem:[%s5208_s7 + $0x1e0] sm:$0xff]  ;;  %v2355_v54 = vld [vmem:[%s5208_s7 + $0x1e8] sm:$0xff] }
 0x274   : > { %v4437_v2 = vpop.eup %4436  ;;  %4229 = vmatpush3.bf16.msra.mxu0 %v4226_v63  ;;  %4259 = vmatprep.subr.bf16.mxu1 %v4258_v61  ;;  %v2188_v41 = vld [vmem:[%s5502_s10 + $0xb0] sm:$0xff] }
 0x275   : > { %v4439_v34 = vpop.eup %4438  ;;  %3829 = vmatprep.mubr.f32.mxu1 %v2248_v56  ;;  %v1891_v9 = vpop.xlane.xlu1 %1890  ;;  %4231 = vmatprep.subr.bf16.mxu0 %v4230_v20  ;;  %v2123_v40 = vmul.f32 %v4437_v2, %v5263_v21  ;;  %v2338_v21 = vld [vmem:[%s5208_s7 + $0x160] sm:$0xff] }
 0x276   : > { %4448 = vrcp.f32 %v1891_v9  ;;  %3830 = vmatmul.mubr.f32.gmra.mrb[34].mxu1 %v2249_v60  ;;  %v1865_v38 = vpop.xlane.xlu0 %1864  ;;  %v2106_v63 = vmul.f32 %v4439_v34, %v5265_v51  ;;  %v2235_v51 = vmul.f32 %v2171_v14, %v2107_v36  ;;  %v2172_v9 = vld [vmem:[%s5502_s10 + $0x30] sm:$0xff]  ;;  %v4242_v36 = vpack.c.bf16 %v2339_v24, %v2338_v21  ;;  %v2341_v14 = vld [vmem:[%s5208_s7 + $0x178] sm:$0xff]  ;;  %v2174_v21 = vld [vmem:[%s5502_s10 + $0x40] sm:$0xff] }
 0x277   : > { %4261 = vmatpush3.bf16.msra.mxu1 %v4258_v61  ;;  %4450 = vrcp.f32 %v1865_v38  ;;  %v2352_v61 = vld [vmem:[%s5208_s7 + $0x1d0] sm:$0xff]  ;;  %v2173_v38 = vld [vmem:[%s5502_s10 + $0x38] sm:$0xff] }
 0x278   : > { %v4441_v16 = vpop.eup %4440  ;;  %v2234_v25 = vmul.f32 %v2170_v32, %v2106_v63  ;;  %4233 = vmatpush3.bf16.msra.mxu0 %v4230_v20  ;;  %4263 = vmatprep.subr.bf16.mxu1 %v4262_v7  ;;  %v4270_v2 = vpack.c.bf16 %v2353_v46, %v2352_v61  ;;  %v2340_v63 = vld [vmem:[%s5208_s7 + $0x170] sm:$0xff] }
 0x279   : > { %v1897_v45 = vpop.xlane.xlu1 %1896  ;;  %v2122_v27 = vmul.f32 %v4441_v16, %v5275_v15  ;;  %4235 = vmatprep.subr.bf16.mxu0 %v4234_v18  ;;  %v4443_v50 = vpop.eup %4442  ;;  %v2251_v15 = vmul.f32 %v2187_v1, %v2123_v40  ;;  %v2357_v1 = vld [vmem:[%s5208_s7 + $0x1f8] sm:$0xff] }
 0x27a   : > { %4452 = vrcp.f32 %v1897_v45  ;;  %3776 = vmatprep.mubr.f32.mxu0 %v2234_v25  ;;  %v1863_v28 = vpop.xlane.xlu0 %1862  ;;  %v2109_v32 = vmul.f32 %v4443_v50, %v5277_v42  ;;  %v4274_v25 = vpack.c.bf16 %v2355_v54, %v2354_v39  ;;  %v2189_v45 = vld [vmem:[%s5502_s10 + $0xb8] sm:$0xff]  ;;  %v2191_v39 = vld [vmem:[%s5502_s10 + $0xc8] sm:$0xff] }
 0x27b   : > { %4454 = vrcp.f32 %v1863_v28  ;;  %3777 = vmatmul.mubr.f32.gmra.mrb[36].mxu0 %v2235_v51  ;;  %v2250_v20 = vmul.f32 %v2186_v5, %v2122_v27  ;;  %4265 = vmatpush3.bf16.msra.mxu1 %v4262_v7  ;;  %v4246_v51 = vpack.c.bf16 %v2341_v14, %v2340_v63  ;;  %v2356_v27 = vld [vmem:[%s5208_s7 + $0x1f0] sm:$0xff] }
 0x27c   : > { %v4445_v56 = vpop.eup %4444  ;;  %4237 = vmatpush3.bf16.msra.mxu0 %v4234_v18  ;;  %4267 = vmatprep.subr.bf16.mxu1 %v4266_v11  ;;  %v2237_v40 = vmul.f32 %v2173_v38, %v2109_v32  ;;  %v2176_v14 = vld [vmem:[%s5502_s10 + $0x50] sm:$0xff] }
 0x27d   : > { %v4447_v60 = vpop.eup %4446  ;;  %3832 = vmatprep.mubr.f32.mxu1 %v2250_v20  ;;  %v1895_v34 = vpop.xlane.xlu1 %1894  ;;  %4239 = vmatprep.subr.bf16.mxu0 %v4238_v26  ;;  %v2125_v16 = vmul.f32 %v4445_v56, %v5287_v22 }
 0x27e   : > { %4456 = vrcp.f32 %v1895_v34  ;;  %3833 = vmatmul.mubr.f32.gmra.mrb[36].mxu1 %v2251_v15  ;;  %v1869_v7 = vpop.xlane.xlu0 %1868  ;;  %v2108_v18 = vmul.f32 %v4447_v60, %v5289_v6  ;;  %v2175_v15 = vld [vmem:[%s5502_s10 + $0x48] sm:$0xff]  ;;  %v2190_v34 = vld [vmem:[%s5502_s10 + $0xc0] sm:$0xff] }
 0x27f   : > { %4269 = vmatpush3.bf16.msra.mxu1 %v4266_v11  ;;  %4458 = vrcp.f32 %v1869_v7  ;;  %v2253_v46 = vmul.f32 %v2189_v45, %v2125_v16 }
 0x280   : > { %v4449_v10 = vpop.eup %4448  ;;  %v2236_v42 = vmul.f32 %v2172_v9, %v2108_v18  ;;  %4241 = vmatpush3.bf16.msra.mxu0 %v4238_v26  ;;  %4271 = vmatprep.subr.bf16.mxu1 %v4270_v2 }
 0x281   : > { %v1901_v5 = vpop.xlane.xlu1 %1900  ;;  %v2124_v6 = vmul.f32 %v4449_v10, %v5299_v35  ;;  %4243 = vmatprep.subr.bf16.mxu0 %v4242_v36  ;;  %v4451_v11 = vpop.eup %4450  ;;  %v4278_v35 = vpack.c.bf16 %v2357_v1, %v2356_v27  ;;  %v2193_v27 = vld [vmem:[%s5502_s10 + $0xd8] sm:$0xff] }
 0x282   : > { %4460 = vrcp.f32 %v1901_v5  ;;  %3779 = vmatprep.mubr.f32.mxu0 %v2236_v42  ;;  %v1867_v61 = vpop.xlane.xlu0 %1866  ;;  %v2111_v24 = vmul.f32 %v4451_v11, %v5301_v43  ;;  %v2192_v5 = vld [vmem:[%s5502_s10 + $0xd0] sm:$0xff] }
 0x283   : > { %4462 = vrcp.f32 %v1867_v61  ;;  %3780 = vmatmul.mubr.f32.gmra.mrb[38].mxu0 %v2237_v40  ;;  %v2252_v22 = vmul.f32 %v2188_v41, %v2124_v6  ;;  %4273 = vmatpush3.bf16.msra.mxu1 %v4270_v2  ;;  %v2177_v41 = vld [vmem:[%s5502_s10 + $0x58] sm:$0xff] }
 0x284   : > { %v4453_v26 = vpop.eup %4452  ;;  %4245 = vmatpush3.bf16.msra.mxu0 %v4242_v36  ;;  %4275 = vmatprep.subr.bf16.mxu1 %v4274_v25  ;;  %v2239_v36 = vmul.f32 %v2175_v15, %v2111_v24  ;;  %v2194_v24 = vld [vmem:[%s5502_s10 + $0xe0] sm:$0xff] }
 0x285   : > { %v4455_v50 = vpop.eup %4454  ;;  %3835 = vmatprep.mubr.f32.mxu1 %v2252_v22  ;;  %v1899_v28 = vpop.xlane.xlu1 %1898  ;;  %4247 = vmatprep.subr.bf16.mxu0 %v4246_v51  ;;  %v2127_v9 = vmul.f32 %v4453_v26, %v5309_v48  ;;  %v2178_v26 = vld [vmem:[%s5502_s10 + $0x60] sm:$0xff] }
 0x286   : > { %4464 = vrcp.f32 %v1899_v28  ;;  %3836 = vmatmul.mubr.f32.gmra.mrb[38].mxu1 %v2253_v46  ;;  %v1873_v20 = vpop.xlane.xlu0 %1872  ;;  %v2110_v56 = vmul.f32 %v4455_v50, %v5311_v53 }
 0x287   : > { %4277 = vmatpush3.bf16.msra.mxu1 %v4274_v25  ;;  %4466 = vrcp.f32 %v1873_v20  ;;  %v2255_v48 = vmul.f32 %v2191_v39, %v2127_v9 }
 0x288   : > { %v4457_v2 = vpop.eup %4456  ;;  %v2238_v60 = vmul.f32 %v2174_v21, %v2110_v56  ;;  %4249 = vmatpush3.bf16.msra.mxu0 %v4246_v51  ;;  %4279 = vmatprep.subr.bf16.mxu1 %v4278_v35 }
 0x289   : > { %v1905_v32 = vpop.xlane.xlu1 %1904  ;;  %v2126_v43 = vmul.f32 %v4457_v2, %v5317_v49  ;;  %v4459_v54 = vpop.eup %4458 }
 0x28a   : > { %4468 = vrcp.f32 %v1905_v32  ;;  %3782 = vmatprep.mubr.f32.mxu0 %v2238_v60  ;;  %v1871_v53 = vpop.xlane.xlu0 %1870  ;;  %v2113_v49 = vmul.f32 %v4459_v54, %v5319_v13  ;;  %v2195_v60 = vld [vmem:[%s5502_s10 + $0xe8] sm:$0xff]  ;;  %v2181_v54 = vld [vmem:[%s5502_s10 + $0x78] sm:$0xff] }
 0x28b   : > { %4470 = vrcp.f32 %v1871_v53  ;;  %3783 = vmatmul.mubr.f32.gmra.mrb[40].mxu0 %v2239_v36  ;;  %v2254_v7 = vmul.f32 %v2190_v34, %v2126_v43  ;;  %4281 = vmatpush3.bf16.msra.mxu1 %v4278_v35  ;;  %v2179_v35 = vld [vmem:[%s5502_s10 + $0x68] sm:$0xff]  ;;  %v2180_v43 = vld [vmem:[%s5502_s10 + $0x70] sm:$0xff] }
 0x28c   : > { %v4461_v18 = vpop.eup %4460  ;;  %v2241_v45 = vmul.f32 %v2177_v41, %v2113_v49 }
 0x28d   : > { %v4463_v38 = vpop.eup %4462  ;;  %3838 = vmatprep.mubr.f32.mxu1 %v2254_v7  ;;  %v1903_v63 = vpop.xlane.xlu1 %1902  ;;  %v2129_v40 = vmul.f32 %v4461_v18, %v5325_v4 }
 0x28e   : > { %4472 = vrcp.f32 %v1903_v63  ;;  %3839 = vmatmul.mubr.f32.gmra.mrb[40].mxu1 %v2255_v48  ;;  %v1877_v10 = vpop.xlane.xlu0 %1876  ;;  %v2112_v42 = vmul.f32 %v4463_v38, %v5327_v55  ;;  %v2196_v48 = vld [vmem:[%s5502_s10 + $0xf0] sm:$0xff] }
 0x28f   : > { %4474 = vrcp.f32 %v1877_v10  ;;  %v2257_v61 = vmul.f32 %v2193_v27, %v2129_v40  ;;  %v2197_v10 = vld [vmem:[%s5502_s10 + $0xf8] sm:$0xff]  ;;  %v2199_v27 = vld [vmem:[%s5502_s10 + $0x108] sm:$0xff] }
 0x290   : > { %v4465_v16 = vpop.eup %4464  ;;  %v2240_v25 = vmul.f32 %v2176_v14, %v2112_v42 }
 0x291   : > { %v1909_v6 = vpop.xlane.xlu1 %1908  ;;  %v2128_v51 = vmul.f32 %v4465_v16, %v5333_v52  ;;  %v4467_v1 = vpop.eup %4466 }
 0x292   : > { %4476 = vrcp.f32 %v1909_v6  ;;  %3785 = vmatprep.mubr.f32.mxu0 %v2240_v25  ;;  %v1875_v13 = vpop.xlane.xlu0 %1874  ;;  %v2115_v46 = vmul.f32 %v4467_v1, %v5335_v8 }
 0x293   : > { %4478 = vrcp.f32 %v1875_v13  ;;  %3786 = vmatmul.mubr.f32.gmra.mrb[42].mxu0 %v2241_v45  ;;  %v2256_v55 = vmul.f32 %v2192_v5, %v2128_v51  ;;  %v5893_v5 = vld [vmem:[#allocation3_spill] sm:$0xff]  ;;  %v5894_v45 = vld [vmem:[#allocation5_spill] sm:$0xff]  ;;  %v5895_v13 = vld [vmem:[#allocation2_spill] sm:$0xff] }
 0x294   : > { %v4469_v11 = vpop.eup %4468  ;;  %v2243_v15 = vmul.f32 %v2179_v35, %v2115_v46  ;;  %v2215_v46 = vld [vmem:[%s5502_s10 + $0x188] sm:$0xff] }
 0x295   : > { %v4471_v22 = vpop.eup %4470  ;;  %3841 = vmatprep.mubr.f32.mxu1 %v2256_v55  ;;  %v1907_v4 = vpop.xlane.xlu1 %1906  ;;  %v2131_v20 = vmul.f32 %v4469_v11, %v5341_v31  ;;  %v2214_v11 = vld [vmem:[%s5502_s10 + $0x180] sm:$0xff] }
 0x296   : > { %4480 = vrcp.f32 %v1907_v4  ;;  %3842 = vmatmul.mubr.f32.gmra.mrb[42].mxu1 %v2257_v61  ;;  %v2114_v52 = vmul.f32 %v4471_v22, %v5343_v12  ;;  %v1913_v50 = vpop.xlane.xlu0 %1912  ;;  %v5896_v4 = vld [vmem:[#allocation4_spill] sm:$0xff] }
 0x297   : > { %4482 = vrcp.f32 %v1913_v50  ;;  %v2259_v32 = vmul.f32 %v2195_v60, %v2131_v20 }
 0x298   : > { %v4473_v28 = vpop.eup %4472  ;;  %v2242_v21 = vmul.f32 %v2178_v26, %v2114_v52 }
 0x299   : > { %v1945_v56 = vpop.xlane.xlu1 %1944  ;;  %v2130_v2 = vmul.f32 %v4473_v28, %v5349_v23  ;;  %v4475_v34 = vpop.eup %4474 }
 0x29a   : > { %3788 = vmatprep.mubr.f32.mxu0 %v2242_v21  ;;  %4484 = vrcp.f32 %v1945_v56  ;;  %v1911_v8 = vpop.xlane.xlu0 %1910  ;;  %v2117_v39 = vmul.f32 %v4475_v34, %v5351_v17 }
 0x29b   : > { %3789 = vmatmul.mubr.f32.gmra.mrb[44].mxu0 %v2243_v15  ;;  %v2258_v12 = vmul.f32 %v2194_v24, %v2130_v2  ;;  %4486 = vrcp.f32 %v1911_v8  ;;  %v2200_v15 = vld [vmem:[%s5502_s10 + $0x110] sm:$0xff]  ;;  %v2201_v8 = vld [vmem:[%s5502_s10 + $0x118] sm:$0xff] }
 0x29c   : > { %v4477_v9 = vpop.eup %4476  ;;  %v2245_v14 = vmul.f32 %v2181_v54, %v2117_v39  ;;  %v2217_v39 = vld [vmem:[%s5502_s10 + $0x198] sm:$0xff] }
 0x29d   : > { %v4479_v36 = vpop.eup %4478  ;;  %3844 = vmatprep.mubr.f32.mxu1 %v2258_v12  ;;  %v1943_v31 = vpop.xlane.xlu1 %1942  ;;  %v2133_v38 = vmul.f32 %v4477_v9, %v5357_v0  ;;  %v2216_v9 = vld [vmem:[%s5502_s10 + $0x190] sm:$0xff] }
 0x29e   : > { %4488 = vrcp.f32 %v1943_v31  ;;  %3845 = vmatmul.mubr.f32.gmra.mrb[44].mxu1 %v2259_v32  ;;  %v2116_v23 = vmul.f32 %v4479_v36, %v5359_v33  ;;  %v1917_v53 = vpop.xlane.xlu0 %1916 }
 0x29f   : > { %4490 = vrcp.f32 %v1917_v53  ;;  %v2261_v41 = vmul.f32 %v2197_v10, %v2133_v38  ;;  %v2218_v10 = vld [vmem:[%s5502_s10 + $0x1a0] sm:$0xff] }
 0x2a0   : > { %v4481_v7 = vpop.eup %4480  ;;  %v2244_v18 = vmul.f32 %v2180_v43, %v2116_v23 }
 0x2a1   : > { %v1949_v63 = vpop.xlane.xlu1 %1948  ;;  %v2132_v49 = vmul.f32 %v4481_v7, %v5365_v19  ;;  %v4483_v17 = vpop.eup %4482  ;;  %v2198_v19 = vld [vmem:[%s5502_s10 + $0x100] sm:$0xff] }
 0x2a2   : > { %3791 = vmatprep.mubr.f32.mxu0 %v2244_v18  ;;  %4492 = vrcp.f32 %v1949_v63  ;;  %v1915_v42 = vpop.xlane.xlu0 %1914  ;;  %v2135_v40 = vmul.f32 %v4483_v17, %v5893_v5 }
 0x2a3   : > { %3792 = vmatmul.mubr.f32.gmra.mrb[46].mxu0 %v2245_v14  ;;  %v2260_v33 = vmul.f32 %v2196_v48, %v2132_v49  ;;  %4494 = vrcp.f32 %v1915_v42  ;;  %v2203_v14 = vld [vmem:[%s5502_s10 + $0x128] sm:$0xff] }
 0x2a4   : > { %v4485_v16 = vpop.eup %4484  ;;  %v2263_v52 = vmul.f32 %v2199_v27, %v2135_v40  ;;  %v2205_v27 = vld [vmem:[%s5502_s10 + $0x138] sm:$0xff] }
 0x2a5   : > { %3847 = vmatprep.mubr.f32.mxu1 %v2260_v33  ;;  %v1947_v0 = vpop.xlane.xlu1 %1946  ;;  %v4487_v25 = vpop.eup %4486  ;;  %v2151_v55 = vmul.f32 %v4485_v16, %v5895_v13  ;;  %v2219_v16 = vld [vmem:[%s5502_s10 + $0x1a8] sm:$0xff]  ;;  %v2220_v13 = vld [vmem:[%s5502_s10 + $0x1b0] sm:$0xff] }
 0x2a6   : > { %4496 = vrcp.f32 %v1947_v0  ;;  %3848 = vmatmul.mubr.f32.gmra.mrb[46].mxu1 %v2261_v41  ;;  %v1921_v6 = vpop.xlane.xlu0 %1920  ;;  %v2134_v51 = vmul.f32 %v4487_v25, %v5894_v45 }
 0x2a7   : > { %4498 = vrcp.f32 %v1921_v6  ;;  %v2279_v21 = vmul.f32 %v2215_v46, %v2151_v55  ;;  %v5897_v55 = vld [vmem:[#allocation7_spill] sm:$0xff]  ;;  %v2221_v46 = vld [vmem:[%s5502_s10 + $0x1b8] sm:$0xff] }
 0x2a8   : > { %v4489_v1 = vpop.eup %4488  ;;  %v2262_v22 = vmul.f32 %v2198_v19, %v2134_v51 }
 0x2a9   : > { %v1953_v61 = vpop.xlane.xlu1 %1952  ;;  %v2150_v26 = vmul.f32 %v4489_v1, %v5896_v4  ;;  %v4491_v35 = vpop.eup %4490  ;;  %v5898_v4 = vld [vmem:[#allocation6_spill] sm:$0xff] }
 0x2aa   : > { %4500 = vrcp.f32 %v1953_v61  ;;  %3882 = vmatprep.mubr.f32.mxu0 %v2262_v22  ;;  %v1919_v50 = vpop.xlane.xlu0 %1918  ;;  %v2137_v2 = vmul.f32 %v4491_v35, %v5394_v47 }
 0x2ab   : > { %v2278_v28 = vmul.f32 %v2214_v11, %v2150_v26  ;;  %4502 = vrcp.f32 %v1919_v50  ;;  %3883 = vmatmul.mubr.f32.vlgmr.msra.gmra.mrb[48].mxu0 %v2263_v52 }
 0x2ac   : > { %v4493_v24 = vpop.eup %4492  ;;  %v2265_v23 = vmul.f32 %v2201_v8, %v2137_v2  ;;  %v2207_v8 = vld [vmem:[%s5502_s10 + $0x148] sm:$0xff] }
 0x2ad   : > { %3938 = vmatprep.mubr.f32.mxu1 %v2278_v28  ;;  %v1951_v20 = vpop.xlane.xlu1 %1950  ;;  %v4495_v56 = vpop.eup %4494  ;;  %v2153_v32 = vmul.f32 %v4493_v24, %v5399_v3 }
 0x2ae   : > { %4504 = vrcp.f32 %v1951_v20  ;;  %3939 = vmatmul.mubr.f32.vlgmr.msra.gmra.mrb[48].mxu1 %v2279_v21  ;;  %v1925_v60 = vpop.xlane.xlu0 %1924  ;;  %v2136_v34 = vmul.f32 %v4495_v56, %v5402_v37  ;;  %v2206_v20 = vld [vmem:[%s5502_s10 + $0x140] sm:$0xff]  ;;  %v5899_v56 = vld [vmem:[#allocation9_spill] sm:$0xff] }
 0x2af   : > { %4506 = vrcp.f32 %v1925_v60  ;;  %v2281_v37 = vmul.f32 %v2217_v39, %v2153_v32  ;;  %v5900_v60 = vld [vmem:[#allocation11_spill] sm:$0xff]  ;;  %v5901_v32 = vld [vmem:[#allocation8_spill] sm:$0xff]  ;;  %v5902_v39 = vld [vmem:[#allocation10_spill] sm:$0xff] }
 0x2b0   : > { %v4497_v12 = vpop.eup %4496  ;;  %v2264_v31 = vmul.f32 %v2200_v15, %v2136_v34 }
 0x2b1   : > { %v1957_v36 = vpop.xlane.xlu1 %1956  ;;  %v2152_v43 = vmul.f32 %v4497_v12, %v5407_v62  ;;  %v4499_v54 = vpop.eup %4498  ;;  %v2202_v62 = vld [vmem:[%s5502_s10 + $0x120] sm:$0xff] }
 0x2b2   : > { %4508 = vrcp.f32 %v1957_v36  ;;  %3885 = vmatprep.mubr.f32.mxu0 %v2264_v31  ;;  %v1923_v47 = vpop.xlane.xlu0 %1922  ;;  %v2139_v48 = vmul.f32 %v4499_v54, %v5410_v58  ;;  %v2223_v54 = vld [vmem:[%s5502_s10 + $0x1c8] sm:$0xff] }
 0x2b3   : > { %v2280_v53 = vmul.f32 %v2216_v9, %v2152_v43  ;;  %4510 = vrcp.f32 %v1923_v47  ;;  %3886 = vmatmul.mubr.f32.gmra.mrb[50].mxu0 %v2265_v23  ;;  %v2222_v9 = vld [vmem:[%s5502_s10 + $0x1c0] sm:$0xff] }
 0x2b4   : > { %v4501_v7 = vpop.eup %4500  ;;  %v2267_v0 = vmul.f32 %v2203_v14, %v2139_v48 }
 0x2b5   : > { %3941 = vmatprep.mubr.f32.mxu1 %v2280_v53  ;;  %v1955_v3 = vpop.xlane.xlu1 %1954  ;;  %v4503_v18 = vpop.eup %4502  ;;  %v2155_v17 = vmul.f32 %v4501_v7, %v5415_v44 }
 0x2b6   : > { %4512 = vrcp.f32 %v1955_v3  ;;  %3942 = vmatmul.mubr.f32.gmra.mrb[50].mxu1 %v2281_v37  ;;  %v1929_v38 = vpop.xlane.xlu0 %1928  ;;  %v2138_v63 = vmul.f32 %v4503_v18, %v5418_v29 }
 0x2b7   : > { %4514 = vrcp.f32 %v1929_v38  ;;  %v2283_v29 = vmul.f32 %v2219_v16, %v2155_v17  ;;  %v2208_v38 = vld [vmem:[%s5502_s10 + $0x150] sm:$0xff]  ;;  %v2209_v17 = vld [vmem:[%s5502_s10 + $0x158] sm:$0xff] }
 0x2b8   : > { %v4505_v49 = vpop.eup %4504  ;;  %v2266_v33 = vmul.f32 %v2202_v62, %v2138_v63  ;;  %v5903_v63 = vld [vmem:[#allocation12_spill] sm:$0xff] }
 0x2b9   : > { %v1961_v42 = vpop.xlane.xlu1 %1960  ;;  %v2154_v41 = vmul.f32 %v4505_v49, %v5423_v57  ;;  %v4507_v25 = vpop.eup %4506  ;;  %v2204_v57 = vld [vmem:[%s5502_s10 + $0x130] sm:$0xff]  ;;  %v5904_v49 = vld [vmem:[#allocation17_spill] sm:$0xff] }
 0x2ba   : > { %4516 = vrcp.f32 %v1961_v42  ;;  %3888 = vmatprep.mubr.f32.mxu0 %v2266_v33  ;;  %v1927_v58 = vpop.xlane.xlu0 %1926  ;;  %v2141_v6 = vmul.f32 %v4507_v25, %v5426_v59  ;;  %v2224_v33 = vld [vmem:[%s5502_s10 + $0x1d0] sm:$0xff]  ;;  %v5906_v25 = vld [vmem:[#allocation14_spill] sm:$0xff] }
 0x2bb   : > { %v2282_v5 = vmul.f32 %v2218_v10, %v2154_v41  ;;  %4518 = vrcp.f32 %v1927_v58  ;;  %3889 = vmatmul.mubr.f32.gmra.mrb[52].mxu0 %v2267_v0  ;;  %v5905_v41 = vld [vmem:[#allocation16_spill] sm:$0xff] }
 0x2bc   : > { %v4509_v40 = vpop.eup %4508  ;;  %v2269_v52 = vmul.f32 %v2205_v27, %v2141_v6 }
 0x2bd   : > { %3944 = vmatprep.mubr.f32.mxu1 %v2282_v5  ;;  %v1959_v44 = vpop.xlane.xlu1 %1958  ;;  %v4511_v19 = vpop.eup %4510  ;;  %v2157_v11 = vmul.f32 %v4509_v40, %v5897_v55  ;;  %v2225_v5 = vld [vmem:[%s5502_s10 + $0x1d8] sm:$0xff] }
 0x2be   : > { %4520 = vrcp.f32 %v1959_v44  ;;  %3945 = vmatmul.mubr.f32.gmra.mrb[52].mxu1 %v2283_v29  ;;  %v1933_v45 = vpop.xlane.xlu0 %1932  ;;  %v2140_v51 = vmul.f32 %v4511_v19, %v5434_v30 }
 0x2bf   : > { %4522 = vrcp.f32 %v1933_v45  ;;  %v2285_v30 = vmul.f32 %v2221_v46, %v2157_v11  ;;  %v2226_v46 = vld [vmem:[%s5502_s10 + $0x1e0] sm:$0xff] }
 0x2c0   : > { %v4513_v1 = vpop.eup %4512  ;;  %v2268_v22 = vmul.f32 %v2204_v57, %v2140_v51 }
 0x2c1   : > { %v1965_v61 = vpop.xlane.xlu1 %1964  ;;  %v2156_v26 = vmul.f32 %v4513_v1, %v5898_v4  ;;  %v4515_v35 = vpop.eup %4514  ;;  %v2210_v1 = vld [vmem:[%s5502_s10 + $0x160] sm:$0xff]  ;;  %v2211_v4 = vld [vmem:[%s5502_s10 + $0x168] sm:$0xff] }
 0x2c2   : > { %4524 = vrcp.f32 %v1965_v61  ;;  %3891 = vmatprep.mubr.f32.mxu0 %v2268_v22  ;;  %v1931_v59 = vpop.xlane.xlu0 %1930  ;;  %v2143_v15 = vmul.f32 %v4515_v35, %v5899_v56  ;;  %v5908_v61 = vld [vmem:[#allocation19_spill] sm:$0xff] }
 0x2c3   : > { %v2284_v50 = vmul.f32 %v2220_v13, %v2156_v26  ;;  %4526 = vrcp.f32 %v1931_v59  ;;  %3892 = vmatmul.mubr.f32.gmra.mrb[54].mxu0 %v2269_v52  ;;  %v5907_v13 = vld [vmem:[#allocation13_spill] sm:$0xff]  ;;  %v5909_v52 = vld [vmem:[#allocation18_spill] sm:$0xff] }
 0x2c4   : > { %v4517_v28 = vpop.eup %4516  ;;  %v2271_v47 = vmul.f32 %v2207_v8, %v2143_v15  ;;  %v2228_v15 = vld [vmem:[%s5502_s10 + $0x1f0] sm:$0xff] }
 0x2c5   : > { %3947 = vmatprep.mubr.f32.mxu1 %v2284_v50  ;;  %v1963_v21 = vpop.xlane.xlu1 %1962  ;;  %v4519_v24 = vpop.eup %4518  ;;  %v2159_v36 = vmul.f32 %v4517_v28, %v5901_v32  ;;  %v5910_v50 = vld [vmem:[#allocation20_spill] sm:$0xff]  ;;  %v2227_v28 = vld [vmem:[%s5502_s10 + $0x1e8] sm:$0xff] }
 0x2c6   : > { %4528 = vrcp.f32 %v1963_v21  ;;  %3948 = vmatmul.mubr.f32.gmra.mrb[54].mxu1 %v2285_v30  ;;  %v1937_v2 = vpop.xlane.xlu0 %1936  ;;  %v2142_v34 = vmul.f32 %v4519_v24, %v5900_v60  ;;  %v5911_v60 = vld [vmem:[#allocation21_spill] sm:$0xff]  ;;  %v2212_v8 = vld [vmem:[%s5502_s10 + $0x170] sm:$0xff] }
 0x2c7   : > { %4530 = vrcp.f32 %v1937_v2  ;;  %v2287_v3 = vmul.f32 %v2223_v54, %v2159_v36 }
 0x2c8   : > { %v4521_v12 = vpop.eup %4520  ;;  %v2270_v43 = vmul.f32 %v2206_v20, %v2142_v34 }
 0x2c9   : > { %v1969_v31 = vpop.xlane.xlu1 %1968  ;;  %v2158_v23 = vmul.f32 %v4521_v12, %v5902_v39  ;;  %v4523_v53 = vpop.eup %4522  ;;  %v5912_v12 = vld [vmem:[#allocation22_spill] sm:$0xff] }
 0x2ca   : > { %4532 = vrcp.f32 %v1969_v31  ;;  %3894 = vmatprep.mubr.f32.mxu0 %v2270_v43  ;;  %v1935_v37 = vpop.xlane.xlu0 %1934  ;;  %v2145_v14 = vmul.f32 %v4523_v53, %v5903_v63  ;;  %v2229_v43 = vld [vmem:[%s5502_s10 + $0x1f8] sm:$0xff]  ;;  %v5914_v53 = vld [vmem:[#allocation24_spill] sm:$0xff] }
 0x2cb   : > { %v2286_v7 = vmul.f32 %v2222_v9, %v2158_v23  ;;  %4534 = vrcp.f32 %v1935_v37  ;;  %3895 = vmatmul.mubr.f32.gmra.mrb[56].mxu0 %v2271_v47  ;;  %v5913_v23 = vld [vmem:[#allocation23_spill] sm:$0xff]  ;;  %v2213_v47 = vld [vmem:[%s5502_s10 + $0x178] sm:$0xff] }
 0x2cc   : > { %v4525_v18 = vpop.eup %4524  ;;  %v2273_v40 = vmul.f32 %v2209_v17, %v2145_v14 }
 0x2cd   : > { %3950 = vmatprep.mubr.f32.mxu1 %v2286_v7  ;;  %v1967_v62 = vpop.xlane.xlu1 %1966  ;;  %v4527_v48 = vpop.eup %4526  ;;  %v2161_v16 = vmul.f32 %v4525_v18, %v5905_v41 }
 0x2ce   : > { %4536 = vrcp.f32 %v1967_v62  ;;  %3951 = vmatmul.mubr.f32.gmra.mrb[56].mxu1 %v2287_v3  ;;  %v2144_v10 = vmul.f32 %v4527_v48, %v5904_v49 }
 0x2cf   : > { %v2289_v6 = vmul.f32 %v2225_v5, %v2161_v16 }
 0x2d0   : > { %v4529_v42 = vpop.eup %4528  ;;  %v2272_v0 = vmul.f32 %v2208_v38, %v2144_v10 }
 0x2d1   : > { %v2160_v58 = vmul.f32 %v4529_v42, %v5906_v25  ;;  %v4531_v44 = vpop.eup %4530 }
 0x2d2   : > { %v1971_v29 = vpop.xlane.xlu1 %1970  ;;  %3897 = vmatprep.mubr.f32.mxu0 %v2272_v0  ;;  %v2147_v55 = vmul.f32 %v4531_v44, %v5907_v13 }
 0x2d3   : > { %4538 = vrcp.f32 %v1971_v29  ;;  %v1939_v19 = vpop.xlane.xlu0 %1938  ;;  %v2288_v57 = vmul.f32 %v2224_v33, %v2160_v58  ;;  %3898 = vmatmul.mubr.f32.gmra.mrb[58].mxu0 %v2273_v40 }
 0x2d4   : > { %4540 = vrcp.f32 %v1939_v19  ;;  %v4533_v45 = vpop.eup %4532  ;;  %v2275_v21 = vmul.f32 %v2211_v4, %v2147_v55 }
 0x2d5   : > { %3953 = vmatprep.mubr.f32.mxu1 %v2288_v57  ;;  %v4535_v51 = vpop.eup %4534  ;;  %v2163_v35 = vmul.f32 %v4533_v45, %v5909_v52 }
 0x2d6   : > { %v1973_v27 = vpop.xlane.xlu1 %1972  ;;  %3954 = vmatmul.mubr.f32.gmra.mrb[58].mxu1 %v2289_v6  ;;  %v2146_v22 = vmul.f32 %v4535_v51, %v5908_v61 }
 0x2d7   : > { %4542 = vrcp.f32 %v1973_v27  ;;  %v1941_v11 = vpop.xlane.xlu0 %1940  ;;  %v2291_v20 = vmul.f32 %v2227_v28, %v2163_v35 }
 0x2d8   : > { %v4537_v26 = vpop.eup %4536  ;;  %4544 = vrcp.f32 %v1941_v11  ;;  %v2274_v59 = vmul.f32 %v2210_v1, %v2146_v22 }
 0x2d9   : > { %v2162_v30 = vmul.f32 %v4537_v26, %v5910_v50 }
 0x2da   : > { %3900 = vmatprep.mubr.f32.mxu0 %v2274_v59 }
 0x2db   : > { %v2290_v24 = vmul.f32 %v2226_v46, %v2162_v30  ;;  %3901 = vmatmul.mubr.f32.gmra.mrb[60].mxu0 %v2275_v21 }
 0x2dd   : > { %v4539_v56 = vpop.eup %4538  ;;  %3956 = vmatprep.mubr.f32.mxu1 %v2290_v24 }
 0x2de   : > { %v4541_v2 = vpop.eup %4540  ;;  %3957 = vmatmul.mubr.f32.gmra.mrb[60].mxu1 %v2291_v20  ;;  %v2164_v34 = vmul.f32 %v4539_v56, %v5911_v60 }
 0x2df   : > { %v2148_v9 = vmul.f32 %v4541_v2, %v5912_v12 }
 0x2e0   : > { %v2292_v32 = vmul.f32 %v2228_v15, %v2164_v34 }
 0x2e1   : > { %v4543_v36 = vpop.eup %4542  ;;  %v2276_v31 = vmul.f32 %v2212_v8, %v2148_v9 }
 0x2e2   : > { %v4545_v39 = vpop.eup %4544  ;;  %3959 = vmatprep.mubr.f32.mxu1 %v2292_v32  ;;  %v2165_v54 = vmul.f32 %v4543_v36, %v5913_v23 }
 0x2e3   : > { %3903 = vmatprep.mubr.f32.mxu0 %v2276_v31  ;;  %v2149_v37 = vmul.f32 %v4545_v39, %v5914_v53 }
 0x2e4   : > { %v2293_v7 = vmul.f32 %v2229_v43, %v2165_v54 }
 0x2e5   : > { %v2277_v3 = vmul.f32 %v2213_v47, %v2149_v37 }
 0x2e6   : > { %3960 = vmatmul.mubr.f32.gmra.mrb[62].mxu1 %v2293_v7 }
 0x2e7   : > { %3904 = vmatmul.mubr.f32.gmra.mrb[62].mxu0 %v2277_v3 }
 0x33e   : > { %v3772_v18 = vpop.f32.mrb[32].mxu0 }
 0x33f   : > { %2939 = vst.msk [vmem:[%s5666_s13 + $0x8] sm:$0xff] %vm561_vm0, %v3772_v18  ;;  %v2424_v62 = vpop.f32.mrb[33].mxu0 }
 0x340   : > { %2938 = vst.msk [vmem:[%s5666_s13] sm:$0xff] %vm561_vm0, %v2424_v62 }
 0x341   : > { %v3828_v48 = vpop.f32.mrb[32].mxu1 }
 0x342   : > { %2955 = vst.msk [vmem:[%s5666_s13 + $0x88] sm:$0xff] %vm561_vm0, %v3828_v48  ;;  %v2569_v38 = vpop.f32.mrb[33].mxu1 }
 0x343   : > { %2954 = vst.msk [vmem:[%s5666_s13 + $0x80] sm:$0xff] %vm561_vm0, %v2569_v38 }
 0x346   : > { %v3775_v63 = vpop.f32.mrb[34].mxu0 }
 0x347   : > { %2941 = vst.msk [vmem:[%s5666_s13 + $0x18] sm:$0xff] %vm561_vm0, %v3775_v63  ;;  %v2434_v14 = vpop.f32.mrb[35].mxu0 }
 0x348   : > { %2940 = vst.msk [vmem:[%s5666_s13 + $0x10] sm:$0xff] %vm561_vm0, %v2434_v14 }
 0x349   : > { %v3831_v49 = vpop.f32.mrb[34].mxu1 }
 0x34a   : > { %2957 = vst.msk [vmem:[%s5666_s13 + $0x98] sm:$0xff] %vm561_vm0, %v3831_v49  ;;  %v2579_v10 = vpop.f32.mrb[35].mxu1 }
 0x34b   : > { %2956 = vst.msk [vmem:[%s5666_s13 + $0x90] sm:$0xff] %vm561_vm0, %v2579_v10 }
 0x34e   : > { %v3778_v17 = vpop.f32.mrb[36].mxu0 }
 0x34f   : > { %2943 = vst.msk [vmem:[%s5666_s13 + $0x28] sm:$0xff] %vm561_vm0, %v3778_v17  ;;  %v2444_v42 = vpop.f32.mrb[37].mxu0 }
 0x350   : > { %2942 = vst.msk [vmem:[%s5666_s13 + $0x20] sm:$0xff] %vm561_vm0, %v2444_v42 }
 0x351   : > { %v3834_v33 = vpop.f32.mrb[36].mxu1 }
 0x352   : > { %2959 = vst.msk [vmem:[%s5666_s13 + $0xa8] sm:$0xff] %vm561_vm0, %v3834_v33  ;;  %v2589_v41 = vpop.f32.mrb[37].mxu1 }
 0x353   : > { %2958 = vst.msk [vmem:[%s5666_s13 + $0xa0] sm:$0xff] %vm561_vm0, %v2589_v41 }
 0x356   : > { %v3781_v16 = vpop.f32.mrb[38].mxu0 }
 0x357   : > { %2945 = vst.msk [vmem:[%s5666_s13 + $0x38] sm:$0xff] %vm561_vm0, %v3781_v16  ;;  %v2454_v0 = vpop.f32.mrb[39].mxu0 }
 0x358   : > { %2944 = vst.msk [vmem:[%s5666_s13 + $0x30] sm:$0xff] %vm561_vm0, %v2454_v0 }
 0x359   : > { %v3837_v25 = vpop.f32.mrb[38].mxu1 }
 0x35a   : > { %2961 = vst.msk [vmem:[%s5666_s13 + $0xb8] sm:$0xff] %vm561_vm0, %v3837_v25  ;;  %v2599_v58 = vpop.f32.mrb[39].mxu1 }
 0x35b   : > { %2960 = vst.msk [vmem:[%s5666_s13 + $0xb0] sm:$0xff] %vm561_vm0, %v2599_v58 }
 0x35e   : > { %v3784_v5 = vpop.f32.mrb[40].mxu0 }
 0x35f   : > { %2947 = vst.msk [vmem:[%s5666_s13 + $0x48] sm:$0xff] %vm561_vm0, %v3784_v5  ;;  %v2464_v29 = vpop.f32.mrb[41].mxu0 }
 0x360   : > { %2946 = vst.msk [vmem:[%s5666_s13 + $0x40] sm:$0xff] %vm561_vm0, %v2464_v29 }
 0x361   : > { %v3840_v40 = vpop.f32.mrb[40].mxu1 }
 0x362   : > { %2963 = vst.msk [vmem:[%s5666_s13 + $0xc8] sm:$0xff] %vm561_vm0, %v3840_v40  ;;  %v2609_v44 = vpop.f32.mrb[41].mxu1 }
 0x363   : > { %2962 = vst.msk [vmem:[%s5666_s13 + $0xc0] sm:$0xff] %vm561_vm0, %v2609_v44 }
 0x366   : > { %v3787_v19 = vpop.f32.mrb[42].mxu0 }
 0x367   : > { %2949 = vst.msk [vmem:[%s5666_s13 + $0x58] sm:$0xff] %vm561_vm0, %v3787_v19  ;;  %v2474_v57 = vpop.f32.mrb[43].mxu0 }
 0x368   : > { %2948 = vst.msk [vmem:[%s5666_s13 + $0x50] sm:$0xff] %vm561_vm0, %v2474_v57 }
 0x369   : > { %v3843_v6 = vpop.f32.mrb[42].mxu1 }
 0x36a   : > { %2965 = vst.msk [vmem:[%s5666_s13 + $0xd8] sm:$0xff] %vm561_vm0, %v3843_v6  ;;  %v2619_v45 = vpop.f32.mrb[43].mxu1 }
 0x36b   : > { %2964 = vst.msk [vmem:[%s5666_s13 + $0xd0] sm:$0xff] %vm561_vm0, %v2619_v45 }
 0x36e   : > { %v3790_v51 = vpop.f32.mrb[44].mxu0 }
 0x36f   : > { %2951 = vst.msk [vmem:[%s5666_s13 + $0x68] sm:$0xff] %vm561_vm0, %v3790_v51  ;;  %v2484_v27 = vpop.f32.mrb[45].mxu0 }
 0x370   : > { %2950 = vst.msk [vmem:[%s5666_s13 + $0x60] sm:$0xff] %vm561_vm0, %v2484_v27 }
 0x371   : > { %v3846_v1 = vpop.f32.mrb[44].mxu1 }
 0x372   : > { %2967 = vst.msk [vmem:[%s5666_s13 + $0xe8] sm:$0xff] %vm561_vm0, %v3846_v1  ;;  %v2629_v13 = vpop.f32.mrb[45].mxu1 }
 0x373   : > { %2966 = vst.msk [vmem:[%s5666_s13 + $0xe0] sm:$0xff] %vm561_vm0, %v2629_v13 }
 0x376   : > { %v3793_v55 = vpop.f32.mrb[46].mxu0 }
 0x377   : > { %2953 = vst.msk [vmem:[%s5666_s13 + $0x78] sm:$0xff] %vm561_vm0, %v3793_v55  ;;  %v2494_v11 = vpop.f32.mrb[47].mxu0 }
 0x378   : > { %2952 = vst.msk [vmem:[%s5666_s13 + $0x70] sm:$0xff] %vm561_vm0, %v2494_v11 }
 0x379   : > { %v3849_v61 = vpop.f32.mrb[46].mxu1 }
 0x37a   : > { %2969 = vst.msk [vmem:[%s5666_s13 + $0xf8] sm:$0xff] %vm561_vm0, %v3849_v61  ;;  %v2639_v22 = vpop.f32.mrb[47].mxu1 }
 0x37b   : > { %2968 = vst.msk [vmem:[%s5666_s13 + $0xf0] sm:$0xff] %vm561_vm0, %v2639_v22 }
 0x37e   : > { %v3884_v4 = vpop.f32.mrb[48].mxu0 }
 0x37f   : > { %2971 = vst.msk [vmem:[%s5666_s13 + $0x108] sm:$0xff] %vm561_vm0, %v3884_v4  ;;  %v2714_v26 = vpop.f32.mrb[49].mxu0 }
 0x380   : > { %2970 = vst.msk [vmem:[%s5666_s13 + $0x100] sm:$0xff] %vm561_vm0, %v2714_v26 }
 0x381   : > { %v3940_v46 = vpop.f32.mrb[48].mxu1 }
 0x382   : > { %2987 = vst.msk [vmem:[%s5666_s13 + $0x188] sm:$0xff] %vm561_vm0, %v3940_v46  ;;  %v2859_v52 = vpop.f32.mrb[49].mxu1 }
 0x383   : > { %2986 = vst.msk [vmem:[%s5666_s13 + $0x180] sm:$0xff] %vm561_vm0, %v2859_v52 }
 0x386   : > { %v3887_v35 = vpop.f32.mrb[50].mxu0 }
 0x387   : > { %2973 = vst.msk [vmem:[%s5666_s13 + $0x118] sm:$0xff] %vm561_vm0, %v3887_v35  ;;  %v2724_v59 = vpop.f32.mrb[51].mxu0 }
 0x388   : > { %2972 = vst.msk [vmem:[%s5666_s13 + $0x110] sm:$0xff] %vm561_vm0, %v2724_v59 }
 0x389   : > { %v3943_v50 = vpop.f32.mrb[50].mxu1 }
 0x38a   : > { %2989 = vst.msk [vmem:[%s5666_s13 + $0x198] sm:$0xff] %vm561_vm0, %v3943_v50  ;;  %v2869_v30 = vpop.f32.mrb[51].mxu1 }
 0x38b   : > { %2988 = vst.msk [vmem:[%s5666_s13 + $0x190] sm:$0xff] %vm561_vm0, %v2869_v30 }
 0x38e   : > { %v3890_v28 = vpop.f32.mrb[52].mxu0 }
 0x38f   : > { %2975 = vst.msk [vmem:[%s5666_s13 + $0x128] sm:$0xff] %vm561_vm0, %v3890_v28  ;;  %v2734_v21 = vpop.f32.mrb[53].mxu0 }
 0x390   : > { %2974 = vst.msk [vmem:[%s5666_s13 + $0x120] sm:$0xff] %vm561_vm0, %v2734_v21 }
 0x391   : > { %v3946_v24 = vpop.f32.mrb[52].mxu1 }
 0x392   : > { %2991 = vst.msk [vmem:[%s5666_s13 + $0x1a8] sm:$0xff] %vm561_vm0, %v3946_v24  ;;  %v2879_v20 = vpop.f32.mrb[53].mxu1 }
 0x393   : > { %2990 = vst.msk [vmem:[%s5666_s13 + $0x1a0] sm:$0xff] %vm561_vm0, %v2879_v20 }
 0x396   : > { %v3893_v56 = vpop.f32.mrb[54].mxu0 }
 0x397   : > { %2977 = vst.msk [vmem:[%s5666_s13 + $0x138] sm:$0xff] %vm561_vm0, %v3893_v56  ;;  %v2744_v15 = vpop.f32.mrb[55].mxu0 }
 0x398   : > { %2976 = vst.msk [vmem:[%s5666_s13 + $0x130] sm:$0xff] %vm561_vm0, %v2744_v15 }
 0x399   : > { %v3949_v2 = vpop.f32.mrb[54].mxu1 }
 0x39a   : > { %2993 = vst.msk [vmem:[%s5666_s13 + $0x1b8] sm:$0xff] %vm561_vm0, %v3949_v2  ;;  %v2889_v60 = vpop.f32.mrb[55].mxu1 }
 0x39b   : > { %2992 = vst.msk [vmem:[%s5666_s13 + $0x1b0] sm:$0xff] %vm561_vm0, %v2889_v60 }
 0x39e   : > { %v3896_v34 = vpop.f32.mrb[56].mxu0 }
 0x39f   : > { %2979 = vst.msk [vmem:[%s5666_s13 + $0x148] sm:$0xff] %vm561_vm0, %v3896_v34  ;;  %v2754_v8 = vpop.f32.mrb[57].mxu0 }
 0x3a0   : > { %2978 = vst.msk [vmem:[%s5666_s13 + $0x140] sm:$0xff] %vm561_vm0, %v2754_v8 }
 0x3a1   : > { %v3952_v12 = vpop.f32.mrb[56].mxu1 }
 0x3a2   : > { %2995 = vst.msk [vmem:[%s5666_s13 + $0x1c8] sm:$0xff] %vm561_vm0, %v3952_v12  ;;  %v2899_v9 = vpop.f32.mrb[57].mxu1 }
 0x3a3   : > { %2994 = vst.msk [vmem:[%s5666_s13 + $0x1c0] sm:$0xff] %vm561_vm0, %v2899_v9 }
 0x3a6   : > { %v3899_v32 = vpop.f32.mrb[58].mxu0 }
 0x3a7   : > { %2981 = vst.msk [vmem:[%s5666_s13 + $0x158] sm:$0xff] %vm561_vm0, %v3899_v32  ;;  %v2764_v36 = vpop.f32.mrb[59].mxu0 }
 0x3a8   : > { %2980 = vst.msk [vmem:[%s5666_s13 + $0x150] sm:$0xff] %vm561_vm0, %v2764_v36 }
 0x3a9   : > { %v3955_v31 = vpop.f32.mrb[58].mxu1 }
 0x3aa   : > { %2997 = vst.msk [vmem:[%s5666_s13 + $0x1d8] sm:$0xff] %vm561_vm0, %v3955_v31  ;;  %v2909_v43 = vpop.f32.mrb[59].mxu1 }
 0x3ab   : > { %2996 = vst.msk [vmem:[%s5666_s13 + $0x1d0] sm:$0xff] %vm561_vm0, %v2909_v43 }
 0x3ae   : > { %v3902_v39 = vpop.f32.mrb[60].mxu0 }
 0x3af   : > { %2983 = vst.msk [vmem:[%s5666_s13 + $0x168] sm:$0xff] %vm561_vm0, %v3902_v39  ;;  %v2774_v23 = vpop.f32.mrb[61].mxu0 }
 0x3b0   : > { %2982 = vst.msk [vmem:[%s5666_s13 + $0x160] sm:$0xff] %vm561_vm0, %v2774_v23 }
 0x3b1   : > { %v3958_v54 = vpop.f32.mrb[60].mxu1 }
 0x3b2   : > { %2999 = vst.msk [vmem:[%s5666_s13 + $0x1e8] sm:$0xff] %vm561_vm0, %v3958_v54  ;;  %v2919_v47 = vpop.f32.mrb[61].mxu1 }
 0x3b3   : > { %2998 = vst.msk [vmem:[%s5666_s13 + $0x1e0] sm:$0xff] %vm561_vm0, %v2919_v47 }
 0x3b9   : > { %v3961_v53 = vpop.f32.mrb[62].mxu1 }
 0x3ba   : > { %3001 = vst.msk [vmem:[%s5666_s13 + $0x1f8] sm:$0xff] %vm561_vm0, %v3961_v53  ;;  %v3905_v37 = vpop.f32.mrb[62].mxu0  ;;  %v2929_v7 = vpop.f32.mrb[63].mxu1 }
 0x3bb   : > { %2985 = vst.msk [vmem:[%s5666_s13 + $0x178] sm:$0xff] %vm561_vm0, %v3905_v37  ;;  %3000 = vst.msk [vmem:[%s5666_s13 + $0x1f0] sm:$0xff] %vm561_vm0, %v2929_v7  ;;  %v2784_v3 = vpop.f32.mrb[63].mxu0 }
 0x3bc   : > { %2984 = vst.msk [vmem:[%s5666_s13 + $0x170] sm:$0xff] %vm561_vm0, %v2784_v3 }
 0x3bd PF: > { %s15_s18 = sadd.s32 1, %s4552_s18  }
 0x3be   : > { %p12_p4 = scmp.ge.s32.totalorder %s15_s18, 4  }
 0x3c0   :  { %14 = sbr.rel (!%p12_p4) target bundleno = 1 (0x1), region = 82 }

</bundles_post_ra>
